<compile_context>
chip_gen: v5e
topology: v5e:2x2
jax: 0.10.0
libtpu: 0.0.40
codegen_flags: <defaults>
</compile_context>

<pallas_src>
import functools

import jax
import jax.numpy as jnp
from jax.experimental import pallas as pl
from jax.experimental.pallas import tpu as pltpu

BN_EPS = 1e-5
LANE = 128
TH_MAX = 8  # conv-output rows per conv2/conv3 grid step (small acc, >=2 tiles)


def _round_up(v, m):
    return (v + m - 1) // m * m


def _vmem_limit_bytes():
    # Queried per pallas_call (not at import) so the right cap is used under
    # AOT / mixed-device compilation (v7x: 64 MiB physical).
    try:
        cap = int(pltpu.get_tpu_info().vmem_capacity_bytes)
    except Exception:
        return None
    return min(cap - cap // 4, 100 * 1024 * 1024)


def _pick_tm(m, tmax=512):
    """Row tile for the 1x1-conv matmuls: prefer 512/256 (MXU-friendly on
    v6e/v7x) when padding waste is small; always a multiple of 16."""
    if m <= tmax:
        return _round_up(m, 16)
    for t in (512, 256):
        if t <= tmax and _round_up(m, t) - m <= m // 8:
            return t
    n_tiles = -(-m // tmax)
    return _round_up(-(-m // n_tiles), 16)


def _pick_th(h, tmax=TH_MAX):
    for t in range(min(h, tmax), 0, -1):
        if h % t == 0:
            return t
    return 1


# ---------------------------------------------------------------------------
# Kernels
# ---------------------------------------------------------------------------
def _mm_bias_relu_kernel(x_ref, w_ref, b_ref, o_ref):
    # 1x1 conv as matmul (bf16 in, f32 acc) + folded-BN bias + ReLU, bf16 out.
    acc = jnp.dot(x_ref[...], w_ref[...], preferred_element_type=jnp.float32)
    o_ref[...] = jnp.maximum(acc + b_ref[...], 0.0).astype(o_ref.dtype)


def _conv3_conv1_res_kernel(x_ref, w2_ref, b2_ref, w3_ref, b3_ref, r_ref,
                            o_ref, *, th, wp):
    """Fused 3x3 conv (+bias+ReLU) -> 1x1 conv (+bias+residual+ReLU).

    x_ref : (1, (th+3)*wp, Cm)  halo'd window of the padded conv1 output
    w2_ref: (9, Cm, Cm)         BN-scale-folded 3x3 taps, kh-major
    w3_ref: (Cm, Cp)            BN-scale-folded 1x1 weights
    r_ref : (1, th*wp, Cp)      residual rows (width-padded layout)
    o_ref : (1, th*wp, Cp)      output rows (width-padded layout)
    """
    rows = th * wp
    cm = w2_ref.shape[1]
    acc = jnp.zeros((rows, cm), jnp.float32)
    for k in range(9):                                   # unrolled: 9 MXU ops
        kh, kw = divmod(k, 3)
        # Contiguous flat slice with a *static* offset: no per-tap relayout.
        win = x_ref[0, pl.ds(kh * wp + kw, rows), :]
        acc = acc + jnp.dot(win, w2_ref[k], preferred_element_type=jnp.float32)
    h = jnp.maximum(acc + b2_ref[...], 0.0).astype(jnp.bfloat16)
    out = jnp.dot(h, w3_ref[...], preferred_element_type=jnp.float32)
    out = out + b3_ref[...] + r_ref[0].astype(jnp.float32)
    o_ref[0] = jnp.maximum(out, 0.0).astype(o_ref.dtype)


# ---------------------------------------------------------------------------
# pallas_call wrappers
# ---------------------------------------------------------------------------
def matmul_bias_relu(x2d, w, bias):
    """(M,K)@(K,N) + per-channel bias + ReLU, bf16 out (scale pre-folded)."""
    m, k = x2d.shape
    kw_, n = w.shape
    assert k == kw_ and k % LANE == 0 and n % LANE == 0
    tm = _pick_tm(m)
    tn = min(512, n)
    if n % tn:
        tn = n
    mp = _round_up(m, tm)
    if mp != m:
        x2d = jnp.pad(x2d, ((0, mp - m), (0, 0)))

    cost = pl.CostEstimate(
        flops=2 * mp * k * n, transcendentals=0,
        bytes_accessed=(mp * k + k * n + mp * n) * 2 + n * 4)

    out = pl.pallas_call(
        _mm_bias_relu_kernel,
        out_shape=jax.ShapeDtypeStruct((mp, n), jnp.bfloat16),
        grid=(mp // tm, n // tn),
        in_specs=[
            pl.BlockSpec((tm, k), lambda i, j: (i, 0)),
            pl.BlockSpec((k, tn), lambda i, j: (0, j)),
            pl.BlockSpec((1, tn), lambda i, j: (0, j)),
        ],
        out_specs=pl.BlockSpec((tm, tn), lambda i, j: (i, j)),
        compiler_params=pltpu.CompilerParams(
            dimension_semantics=("parallel", "parallel"),
            vmem_limit_bytes=_vmem_limit_bytes()),
        cost_estimate=cost,
    )(x2d, w, bias)
    return out if mp == m else out[:m]


def conv3x3_conv1x1_residual(conv2_in, res2d, w2, b2, w3, b3, *, th, wp):
    """Fused conv2+bn2+relu+conv3+bn3+residual+relu over spatial tiles."""
    n, rows_total, cm = conv2_in.shape
    cp = w3.shape[1]
    rows_in = (th + 3) * wp
    rows_out = th * wp
    n_t = rows_total // rows_in
    assert rows_total == n_t * rows_in and res2d.shape == (n, n_t * rows_out, cp)

    kernel = functools.partial(_conv3_conv1_res_kernel, th=th, wp=wp)
    cost = pl.CostEstimate(
        flops=2 * n * n_t * rows_out * cm * (9 * cm + cp),
        transcendentals=0,
        bytes_accessed=(n * n_t * (rows_in * cm + 2 * rows_out * cp)
                        + 9 * cm * cm + cm * cp) * 2 + (cm + cp) * 4)

    return pl.pallas_call(
        kernel,
        out_shape=jax.ShapeDtypeStruct((n, n_t * rows_out, cp), jnp.bfloat16),
        grid=(n, n_t),
        in_specs=[
            pl.BlockSpec((1, rows_in, cm), lambda b, i: (b, i, 0)),
            pl.BlockSpec((9, cm, cm), lambda b, i: (0, 0, 0)),
            pl.BlockSpec((1, cm), lambda b, i: (0, 0)),
            pl.BlockSpec((cm, cp), lambda b, i: (0, 0)),
            pl.BlockSpec((1, cp), lambda b, i: (0, 0)),
            pl.BlockSpec((1, rows_out, cp), lambda b, i: (b, i, 0)),
        ],
        out_specs=pl.BlockSpec((1, rows_out, cp), lambda b, i: (b, i, 0)),
        compiler_params=pltpu.CompilerParams(
            dimension_semantics=("parallel", "parallel"),
            vmem_limit_bytes=_vmem_limit_bytes()),
        cost_estimate=cost,
    )(conv2_in, w2, b2, w3, b3, res2d)


# ---------------------------------------------------------------------------
# Parameter preparation (done once, outside the per-forward path)
# ---------------------------------------------------------------------------
def _bn_scale_bias(bn):
    scale = bn["gamma"] / jnp.sqrt(bn["running_var"] + BN_EPS)
    bias = bn["beta"] - bn["running_mean"] * scale
    return scale.astype(jnp.float32), bias.astype(jnp.float32)


def prepare_params(params, compute_dtype=jnp.bfloat16):
    """Fold BN scale into weights, transpose, pad channels to 128, bf16-cast."""
    planes, inplanes = params["w1"].shape[:2]
    assert inplanes == 4 * planes, "downsample=None requires inplanes == 4*planes"
    assert int(params["stride"]) == 1, "stride != 1 needs a downsample path"
    cin_p = _round_up(inplanes, LANE)
    mid_p = _round_up(planes, LANE)
    cout_p = _round_up(4 * planes, LANE)

    s1, b1 = _bn_scale_bias(params["bn1"])
    s2, b2 = _bn_scale_bias(params["bn2"])
    s3, b3 = _bn_scale_bias(params["bn3"])

    w1 = params["w1"].reshape(planes, inplanes).T * s1[None, :]      # (Cin, Cm)
    w1 = jnp.pad(w1, ((0, cin_p - inplanes), (0, mid_p - planes)))

    w2 = jnp.transpose(params["w2"], (2, 3, 1, 0)) * s2[None, None, None, :]
    w2 = jnp.pad(w2, ((0, 0), (0, 0), (0, mid_p - planes), (0, mid_p - planes)))
    w2 = w2.reshape(9, mid_p, mid_p)                                 # (9, Cm, Cm)

    w3 = params["w3"].reshape(4 * planes, planes).T * s3[None, :]    # (Cm, Cp)
    w3 = jnp.pad(w3, ((0, mid_p - planes), (0, cout_p - 4 * planes)))

    pad1 = lambda v, c: jnp.pad(v, (0, c - v.shape[0]))[None, :]
    return {
        "out_channels": 4 * planes,
        "w1": w1.astype(compute_dtype), "b1": pad1(b1, mid_p),
        "w2": w2.astype(compute_dtype), "b2": pad1(b2, mid_p),
        "w3": w3.astype(compute_dtype), "b3": pad1(b3, cout_p),
    }


# ---------------------------------------------------------------------------
# Forward
# ---------------------------------------------------------------------------
def bottleneck_forward_nhwc(x_nhwc, prep, *, th_max=TH_MAX):
    """Forward over NHWC input; returns bf16 NHWC (keep this layout across
    chained blocks and only convert to NCHW/f32 at the model edges)."""
    n, h, w, cin = x_nhwc.shape
    cin_p, mid_p = prep["w1"].shape
    cout_p = prep["w3"].shape[1]
    assert cin == prep["out_channels"] and cin_p == cout_p

    wp = _round_up(w + 2, 8)             # padded width (halo + sublane align)
    th = _pick_th(h, th_max)
    n_t = h // th

    # Residual / conv1 input: width-right-padded, channel-padded, bf16.
    x_res = jnp.pad(x_nhwc.astype(jnp.bfloat16),
                    ((0, 0), (0, 0), (0, wp - w), (0, cin_p - cin)))
    x2d = x_res.reshape(n * h * wp, cin_p)

    # conv1 (1x1) + bn1 + relu  (BN scale folded into w1)
    out1 = matmul_bias_relu(x2d, prep["w1"], prep["b1"])

    # Build halo'd per-tile windows of the conv1 output (one fused XLA copy):
    # real pixel (r, c) lives at padded (r + 1, c + 1); all padding is zero.
    o1 = out1.reshape(n, h, wp, mid_p)[:, :, :w, :]
    o1p = jnp.pad(o1, ((0, 0), (1, 2), (1, wp - w - 1), (0, 0)))
    conv2_in = jnp.concatenate(
        [o1p[:, i * th:i * th + th + 3] for i in range(n_t)], axis=1)
    conv2_in = conv2_in.reshape(n, n_t * (th + 3) * wp, mid_p)

    # conv2 (3x3,s1,p1) + bn2 + relu + conv3 (1x1) + bn3 + residual + relu
    res2d = x_res.reshape(n, h * wp, cin_p)
    out3 = conv3x3_conv1x1_residual(conv2_in, res2d, prep["w2"], prep["b2"],
                                    prep["w3"], prep["b3"], th=th, wp=wp)

    out3 = out3.reshape(n, h, wp, cout_p)[:, :, :w, :prep["out_channels"]]
    return out3


def bottleneck_forward(x_nchw, prep):
    """Module-faithful wrapper: NCHW f32 in, NCHW f32 out."""
    x_nhwc = jnp.transpose(x_nchw, (0, 2, 3, 1))
    out = bottleneck_forward_nhwc(x_nhwc, prep)
    return jnp.transpose(out, (0, 3, 1, 2)).astype(jnp.float32)


# ---------------------------------------------------------------------------
# Pure-JAX reference (lax conv), mirroring the kernel's bf16 storage points
# and the inference-mode BN fold (mathematically identical to conv->BN eval).
# ---------------------------------------------------------------------------
def bottleneck_reference(x_nchw, params):
    f32 = jnp.float32
    q = lambda a: a.astype(jnp.bfloat16).astype(f32)   # bf16 round-trip

    def fold(wgt, bn):
        s = bn["gamma"] / jnp.sqrt(bn["running_var"] + BN_EPS)
        b = bn["beta"] - bn["running_mean"] * s
        return wgt * s[:, None, None, None], b

    def conv(y, wgt, pad):
        return jax.lax.conv_general_dilated(
            y, q(wgt), (1, 1), [(pad, pad), (pad, pad)],
            dimension_numbers=("NCHW", "OIHW", "NCHW"),
            preferred_element_type=f32)

    w1f, b1 = fold(params["w1"], params["bn1"])
    w2f, b2 = fold(params["w2"], params["bn2"])
    w3f, b3 = fold(params["w3"], params["bn3"])

    x = q(x_nchw)
    out = q(jnp.maximum(conv(x, w1f, 0) + b1[None, :, None, None], 0.0))
    out = q(jnp.maximum(conv(out, w2f, 1) + b2[None, :, None, None], 0.0))
    out = q(jnp.maximum(conv(out, w3f, 0) + b3[None, :, None, None] + x, 0.0))
    return out


# ---------------------------------------------------------------------------
def make_params(key, inplanes, planes, stride=1):
    ks = jax.random.split(key, 6)

    def bn_params(k, c):
        k1, k2, k3, k4 = jax.random.split(k, 4)
        return {
            "gamma": jax.random.uniform(k1, (c,), jnp.float32, 0.5, 1.5),
            "beta": jax.random.normal(k2, (c,), jnp.float32) * 0.1,
            "running_mean": jax.random.normal(k3, (c,), jnp.float32) * 0.1,
            "running_var": jax.random.uniform(k4, (c,), jnp.float32, 0.5, 1.5),
        }

    return {
        "w1": jax.random.normal(ks[0], (planes, inplanes, 1, 1), jnp.float32) * 0.2,
        "w2": jax.random.normal(ks[1], (planes, planes, 3, 3), jnp.float32) * 0.2,
        "w3": jax.random.normal(ks[2], (planes * 4, planes, 1, 1), jnp.float32) * 0.2,
        "bn1": bn_params(ks[3], planes),
        "bn2": bn_params(ks[4], planes),
        "bn3": bn_params(ks[5], planes * 4),
        "stride": stride,
    }


if __name__ == "__main__":
    key = jax.random.PRNGKey(0)
    kx, kp = jax.random.split(key)

    # downsample=None => inplanes must equal planes*expansion and stride=1.
    planes = 4
    inplanes = planes * 4  # 16
    n, h, w = 2, 16, 16    # H/th = 2 spatial tiles -> exercises the halo path

    x = jax.random.normal(kx, (n, inplanes, h, w), jnp.float32)
    params = make_params(kp, inplanes, planes, stride=1)

    prep = prepare_params(params)  # fold BN / transpose / pad / bf16 once
    fwd = jax.jit(functools.partial(bottleneck_forward, prep=prep))

    out = jax.block_until_ready(fwd(x))
    ref = jax.block_until_ready(bottleneck_reference(x, params))

    assert out.shape == ref.shape == (n, planes * 4, h, w), (out.shape, ref.shape)
    max_err = float(jnp.max(jnp.abs(out - ref)))
    assert jnp.allclose(out, ref, rtol=1e-2, atol=1e-2), max_err

    print("KERNEL_OK")
</pallas_src>

<mosaic_0001>
module attributes {stable_mosaic.version = 11 : i64} {
  func.func @_mm_bias_relu_kernel(%arg0: i32, %arg1: i32, %arg2: memref<256x128xbf16, #tpu.memory_space<vmem>>, %arg3: memref<128x128xbf16, #tpu.memory_space<vmem>>, %arg4: memref<1x128xf32, #tpu.memory_space<vmem>>, %arg5: memref<256x128xbf16, #tpu.memory_space<vmem>>) attributes {dimension_semantics = [#tpu.dimension_semantics<parallel>, #tpu.dimension_semantics<parallel>], iteration_bounds = array<i64: 3, 1>, scalar_prefetch = 0 : i64, scratch_operands = 0 : i64, tpu.core_type = #tpu.core_type<tc>, window_params = [{transform_indices = @transform_0, window_bounds = array<i64: 256, 128>}, {transform_indices = @transform_1, window_bounds = array<i64: 128, 128>}, {transform_indices = @transform_2, window_bounds = array<i64: 1, 128>}, {transform_indices = @transform_3, window_bounds = array<i64: 256, 128>}]} {
    %c0 = arith.constant 0 : index
    %c0_0 = arith.constant 0 : index
    %0 = vector.load %arg2[%c0, %c0_0] : memref<256x128xbf16, #tpu.memory_space<vmem>>, vector<256x128xbf16>
    %c0_1 = arith.constant 0 : index
    %c0_2 = arith.constant 0 : index
    %1 = vector.load %arg3[%c0_1, %c0_2] : memref<128x128xbf16, #tpu.memory_space<vmem>>, vector<128x128xbf16>
    %cst = arith.constant dense<0.000000e+00> : vector<256x128xf32>
    %2 = tpu.matmul %0, %1, %cst {dimension_numbers = #tpu.dot_dimension_numbers<[1], [0], [0], [1], [0, 0, 1, 1], [], []>} : vector<256x128xbf16>, vector<128x128xbf16>, vector<256x128xf32> -> vector<256x128xf32>
    %c0_3 = arith.constant 0 : index
    %c0_4 = arith.constant 0 : index
    %3 = vector.load %arg4[%c0_3, %c0_4] : memref<1x128xf32, #tpu.memory_space<vmem>>, vector<1x128xf32>
    %4 = vector.broadcast %3 : vector<1x128xf32> to vector<256x128xf32>
    %5 = arith.addf %2, %4 : vector<256x128xf32>
    %cst_5 = arith.constant 0.000000e+00 : f32
    %6 = vector.broadcast %cst_5 : f32 to vector<256x128xf32>
    %7 = arith.maximumf %5, %6 : vector<256x128xf32>
    %8 = arith.truncf %7 : vector<256x128xf32> to vector<256x128xbf16>
    %c0_6 = arith.constant 0 : index
    %c0_7 = arith.constant 0 : index
    %9 = vector.load %arg5[%c0_6, %c0_7] : memref<256x128xbf16, #tpu.memory_space<vmem>>, vector<256x128xbf16>
    tpu.vector_store %arg5[%c0_6, %c0_7], %8 {strides = array<i32>} : memref<256x128xbf16, #tpu.memory_space<vmem>>, vector<256x128xbf16>,
    return
  }
  func.func @transform_0(%arg0: i32, %arg1: i32) -> (i32, i32) {
    %c0_i32 = arith.constant 0 : i32
    %c0_i32_0 = arith.constant 0 : i32
    return %arg0, %c0_i32 : i32, i32
  }
  func.func @transform_1(%arg0: i32, %arg1: i32) -> (i32, i32) {
    %c0_i32 = arith.constant 0 : i32
    %c0_i32_0 = arith.constant 0 : i32
    return %c0_i32, %arg1 : i32, i32
  }
  func.func @transform_2(%arg0: i32, %arg1: i32) -> (i32, i32) {
    %c0_i32 = arith.constant 0 : i32
    %c0_i32_0 = arith.constant 0 : i32
    return %c0_i32, %arg1 : i32, i32
  }
  func.func @transform_3(%arg0: i32, %arg1: i32) -> (i32, i32) {
    %c0_i32 = arith.constant 0 : i32
    return %arg0, %arg1 : i32, i32
  }
}

module attributes {stable_mosaic.version = 11 : i64} {
  func.func @_conv3_conv1_res_kernel(%arg0: i32, %arg1: i32, %arg2: memref<1x264x128xbf16, #tpu.memory_space<vmem>>, %arg3: memref<9x128x128xbf16, #tpu.memory_space<vmem>>, %arg4: memref<1x128xf32, #tpu.memory_space<vmem>>, %arg5: memref<128x128xbf16, #tpu.memory_space<vmem>>, %arg6: memref<1x128xf32, #tpu.memory_space<vmem>>, %arg7: memref<1x192x128xbf16, #tpu.memory_space<vmem>>, %arg8: memref<1x192x128xbf16, #tpu.memory_space<vmem>>) attributes {dimension_semantics = [#tpu.dimension_semantics<parallel>, #tpu.dimension_semantics<parallel>], iteration_bounds = array<i64: 2, 2>, scalar_prefetch = 0 : i64, scratch_operands = 0 : i64, tpu.core_type = #tpu.core_type<tc>, window_params = [{transform_indices = @transform_0, window_bounds = array<i64: 1, 264, 128>}, {pipeline_mode = #tpu.pipeline_mode<synchronous>, transform_indices = @transform_1, window_bounds = array<i64: 9, 128, 128>}, {pipeline_mode = #tpu.pipeline_mode<synchronous>, transform_indices = @transform_2, window_bounds = array<i64: 1, 128>}, {pipeline_mode = #tpu.pipeline_mode<synchronous>, transform_indices = @transform_3, window_bounds = array<i64: 128, 128>}, {pipeline_mode = #tpu.pipeline_mode<synchronous>, transform_indices = @transform_4, window_bounds = array<i64: 1, 128>}, {transform_indices = @transform_5, window_bounds = array<i64: 1, 192, 128>}, {transform_indices = @transform_6, window_bounds = array<i64: 1, 192, 128>}]} {
    %cst = arith.constant 0.000000e+00 : f32
    %0 = vector.broadcast %cst : f32 to vector<192x128xf32>
    %c0 = arith.constant 0 : index
    %c0_0 = arith.constant 0 : index
    %c0_1 = arith.constant 0 : index
    %1 = vector.load %arg2[%c0, %c0_0, %c0_1] : memref<1x264x128xbf16, #tpu.memory_space<vmem>>, vector<1x192x128xbf16>
    %2 = vector.shape_cast %1 : vector<1x192x128xbf16> to vector<192x128xbf16>
    %c0_2 = arith.constant 0 : index
    %c0_3 = arith.constant 0 : index
    %c0_4 = arith.constant 0 : index
    %3 = vector.load %arg3[%c0_2, %c0_3, %c0_4] : memref<9x128x128xbf16, #tpu.memory_space<vmem>>, vector<1x128x128xbf16>
    %4 = vector.shape_cast %3 : vector<1x128x128xbf16> to vector<128x128xbf16>
    %cst_5 = arith.constant dense<0.000000e+00> : vector<192x128xf32>
    %5 = tpu.matmul %2, %4, %cst_5 {dimension_numbers = #tpu.dot_dimension_numbers<[1], [0], [0], [1], [0, 0, 1, 1], [], []>} : vector<192x128xbf16>, vector<128x128xbf16>, vector<192x128xf32> -> vector<192x128xf32>
    %6 = arith.addf %0, %5 : vector<192x128xf32>
    %c0_6 = arith.constant 0 : index
    %c1 = arith.constant 1 : index
    %c0_7 = arith.constant 0 : index
    %7 = vector.load %arg2[%c0_6, %c1, %c0_7] : memref<1x264x128xbf16, #tpu.memory_space<vmem>>, vector<1x192x128xbf16>
    %8 = vector.shape_cast %7 : vector<1x192x128xbf16> to vector<192x128xbf16>
    %c1_8 = arith.constant 1 : index
    %c0_9 = arith.constant 0 : index
    %c0_10 = arith.constant 0 : index
    %9 = vector.load %arg3[%c1_8, %c0_9, %c0_10] : memref<9x128x128xbf16, #tpu.memory_space<vmem>>, vector<1x128x128xbf16>
    %10 = vector.shape_cast %9 : vector<1x128x128xbf16> to vector<128x128xbf16>
    %cst_11 = arith.constant dense<0.000000e+00> : vector<192x128xf32>
    %11 = tpu.matmul %8, %10, %cst_11 {dimension_numbers = #tpu.dot_dimension_numbers<[1], [0], [0], [1], [0, 0, 1, 1], [], []>} : vector<192x128xbf16>, vector<128x128xbf16>, vector<192x128xf32> -> vector<192x128xf32>
    %12 = arith.addf %6, %11 : vector<192x128xf32>
    %c0_12 = arith.constant 0 : index
    %c2 = arith.constant 2 : index
    %c0_13 = arith.constant 0 : index
    %13 = vector.load %arg2[%c0_12, %c2, %c0_13] : memref<1x264x128xbf16, #tpu.memory_space<vmem>>, vector<1x192x128xbf16>
    %14 = vector.shape_cast %13 : vector<1x192x128xbf16> to vector<192x128xbf16>
    %c2_14 = arith.constant 2 : index
    %c0_15 = arith.constant 0 : index
    %c0_16 = arith.constant 0 : index
    %15 = vector.load %arg3[%c2_14, %c0_15, %c0_16] : memref<9x128x128xbf16, #tpu.memory_space<vmem>>, vector<1x128x128xbf16>
    %16 = vector.shape_cast %15 : vector<1x128x128xbf16> to vector<128x128xbf16>
    %cst_17 = arith.constant dense<0.000000e+00> : vector<192x128xf32>
    %17 = tpu.matmul %14, %16, %cst_17 {dimension_numbers = #tpu.dot_dimension_numbers<[1], [0], [0], [1], [0, 0, 1, 1], [], []>} : vector<192x128xbf16>, vector<128x128xbf16>, vector<192x128xf32> -> vector<192x128xf32>
    %18 = arith.addf %12, %17 : vector<192x128xf32>
    %c0_18 = arith.constant 0 : index
    %c24 = arith.constant 24 : index
    %c0_19 = arith.constant 0 : index
    %19 = vector.load %arg2[%c0_18, %c24, %c0_19] : memref<1x264x128xbf16, #tpu.memory_space<vmem>>, vector<1x192x128xbf16>
    %20 = vector.shape_cast %19 : vector<1x192x128xbf16> to vector<192x128xbf16>
    %c3 = arith.constant 3 : index
    %c0_20 = arith.constant 0 : index
    %c0_21 = arith.constant 0 : index
    %21 = vector.load %arg3[%c3, %c0_20, %c0_21] : memref<9x128x128xbf16, #tpu.memory_space<vmem>>, vector<1x128x128xbf16>
    %22 = vector.shape_cast %21 : vector<1x128x128xbf16> to vector<128x128xbf16>
    %cst_22 = arith.constant dense<0.000000e+00> : vector<192x128xf32>
    %23 = tpu.matmul %20, %22, %cst_22 {dimension_numbers = #tpu.dot_dimension_numbers<[1], [0], [0], [1], [0, 0, 1, 1], [], []>} : vector<192x128xbf16>, vector<128x128xbf16>, vector<192x128xf32> -> vector<192x128xf32>
    %24 = arith.addf %18, %23 : vector<192x128xf32>
    %c0_23 = arith.constant 0 : index
    %c25 = arith.constant 25 : index
    %c0_24 = arith.constant 0 : index
    %25 = vector.load %arg2[%c0_23, %c25, %c0_24] : memref<1x264x128xbf16, #tpu.memory_space<vmem>>, vector<1x192x128xbf16>
    %26 = vector.shape_cast %25 : vector<1x192x128xbf16> to vector<192x128xbf16>
    %c4 = arith.constant 4 : index
    %c0_25 = arith.constant 0 : index
    %c0_26 = arith.constant 0 : index
    %27 = vector.load %arg3[%c4, %c0_25, %c0_26] : memref<9x128x128xbf16, #tpu.memory_space<vmem>>, vector<1x128x128xbf16>
    %28 = vector.shape_cast %27 : vector<1x128x128xbf16> to vector<128x128xbf16>
    %cst_27 = arith.constant dense<0.000000e+00> : vector<192x128xf32>
    %29 = tpu.matmul %26, %28, %cst_27 {dimension_numbers = #tpu.dot_dimension_numbers<[1], [0], [0], [1], [0, 0, 1, 1], [], []>} : vector<192x128xbf16>, vector<128x128xbf16>, vector<192x128xf32> -> vector<192x128xf32>
    %30 = arith.addf %24, %29 : vector<192x128xf32>
    %c0_28 = arith.constant 0 : index
    %c26 = arith.constant 26 : index
    %c0_29 = arith.constant 0 : index
    %31 = vector.load %arg2[%c0_28, %c26, %c0_29] : memref<1x264x128xbf16, #tpu.memory_space<vmem>>, vector<1x192x128xbf16>
    %32 = vector.shape_cast %31 : vector<1x192x128xbf16> to vector<192x128xbf16>
    %c5 = arith.constant 5 : index
    %c0_30 = arith.constant 0 : index
    %c0_31 = arith.constant 0 : index
    %33 = vector.load %arg3[%c5, %c0_30, %c0_31] : memref<9x128x128xbf16, #tpu.memory_space<vmem>>, vector<1x128x128xbf16>
    %34 = vector.shape_cast %33 : vector<1x128x128xbf16> to vector<128x128xbf16>
    %cst_32 = arith.constant dense<0.000000e+00> : vector<192x128xf32>
    %35 = tpu.matmul %32, %34, %cst_32 {dimension_numbers = #tpu.dot_dimension_numbers<[1], [0], [0], [1], [0, 0, 1, 1], [], []>} : vector<192x128xbf16>, vector<128x128xbf16>, vector<192x128xf32> -> vector<192x128xf32>
    %36 = arith.addf %30, %35 : vector<192x128xf32>
    %c0_33 = arith.constant 0 : index
    %c48 = arith.constant 48 : index
    %c0_34 = arith.constant 0 : index
    %37 = vector.load %arg2[%c0_33, %c48, %c0_34] : memref<1x264x128xbf16, #tpu.memory_space<vmem>>, vector<1x192x128xbf16>
    %38 = vector.shape_cast %37 : vector<1x192x128xbf16> to vector<192x128xbf16>
    %c6 = arith.constant 6 : index
    %c0_35 = arith.constant 0 : index
    %c0_36 = arith.constant 0 : index
    %39 = vector.load %arg3[%c6, %c0_35, %c0_36] : memref<9x128x128xbf16, #tpu.memory_space<vmem>>, vector<1x128x128xbf16>
    %40 = vector.shape_cast %39 : vector<1x128x128xbf16> to vector<128x128xbf16>
    %cst_37 = arith.constant dense<0.000000e+00> : vector<192x128xf32>
    %41 = tpu.matmul %38, %40, %cst_37 {dimension_numbers = #tpu.dot_dimension_numbers<[1], [0], [0], [1], [0, 0, 1, 1], [], []>} : vector<192x128xbf16>, vector<128x128xbf16>, vector<192x128xf32> -> vector<192x128xf32>
    %42 = arith.addf %36, %41 : vector<192x128xf32>
    %c0_38 = arith.constant 0 : index
    %c49 = arith.constant 49 : index
    %c0_39 = arith.constant 0 : index
    %43 = vector.load %arg2[%c0_38, %c49, %c0_39] : memref<1x264x128xbf16, #tpu.memory_space<vmem>>, vector<1x192x128xbf16>
    %44 = vector.shape_cast %43 : vector<1x192x128xbf16> to vector<192x128xbf16>
    %c7 = arith.constant 7 : index
    %c0_40 = arith.constant 0 : index
    %c0_41 = arith.constant 0 : index
    %45 = vector.load %arg3[%c7, %c0_40, %c0_41] : memref<9x128x128xbf16, #tpu.memory_space<vmem>>, vector<1x128x128xbf16>
    %46 = vector.shape_cast %45 : vector<1x128x128xbf16> to vector<128x128xbf16>
    %cst_42 = arith.constant dense<0.000000e+00> : vector<192x128xf32>
    %47 = tpu.matmul %44, %46, %cst_42 {dimension_numbers = #tpu.dot_dimension_numbers<[1], [0], [0], [1], [0, 0, 1, 1], [], []>} : vector<192x128xbf16>, vector<128x128xbf16>, vector<192x128xf32> -> vector<192x128xf32>
    %48 = arith.addf %42, %47 : vector<192x128xf32>
    %c0_43 = arith.constant 0 : index
    %c50 = arith.constant 50 : index
    %c0_44 = arith.constant 0 : index
    %49 = vector.load %arg2[%c0_43, %c50, %c0_44] : memref<1x264x128xbf16, #tpu.memory_space<vmem>>, vector<1x192x128xbf16>
    %50 = vector.shape_cast %49 : vector<1x192x128xbf16> to vector<192x128xbf16>
    %c8 = arith.constant 8 : index
    %c0_45 = arith.constant 0 : index
    %c0_46 = arith.constant 0 : index
    %51 = vector.load %arg3[%c8, %c0_45, %c0_46] : memref<9x128x128xbf16, #tpu.memory_space<vmem>>, vector<1x128x128xbf16>
    %52 = vector.shape_cast %51 : vector<1x128x128xbf16> to vector<128x128xbf16>
    %cst_47 = arith.constant dense<0.000000e+00> : vector<192x128xf32>
    %53 = tpu.matmul %50, %52, %cst_47 {dimension_numbers = #tpu.dot_dimension_numbers<[1], [0], [0], [1], [0, 0, 1, 1], [], []>} : vector<192x128xbf16>, vector<128x128xbf16>, vector<192x128xf32> -> vector<192x128xf32>
    %54 = arith.addf %48, %53 : vector<192x128xf32>
    %c0_48 = arith.constant 0 : index
    %c0_49 = arith.constant 0 : index
    %55 = vector.load %arg4[%c0_48, %c0_49] : memref<1x128xf32, #tpu.memory_space<vmem>>, vector<1x128xf32>
    %56 = vector.broadcast %55 : vector<1x128xf32> to vector<192x128xf32>
    %57 = arith.addf %54, %56 : vector<192x128xf32>
    %cst_50 = arith.constant 0.000000e+00 : f32
    %58 = vector.broadcast %cst_50 : f32 to vector<192x128xf32>
    %59 = arith.maximumf %57, %58 : vector<192x128xf32>
    %60 = arith.truncf %59 : vector<192x128xf32> to vector<192x128xbf16>
    %c0_51 = arith.constant 0 : index
    %c0_52 = arith.constant 0 : index
    %61 = vector.load %arg5[%c0_51, %c0_52] : memref<128x128xbf16, #tpu.memory_space<vmem>>, vector<128x128xbf16>
    %cst_53 = arith.constant dense<0.000000e+00> : vector<192x128xf32>
    %62 = tpu.matmul %60, %61, %cst_53 {dimension_numbers = #tpu.dot_dimension_numbers<[1], [0], [0], [1], [0, 0, 1, 1], [], []>} : vector<192x128xbf16>, vector<128x128xbf16>, vector<192x128xf32> -> vector<192x128xf32>
    %c0_54 = arith.constant 0 : index
    %c0_55 = arith.constant 0 : index
    %63 = vector.load %arg6[%c0_54, %c0_55] : memref<1x128xf32, #tpu.memory_space<vmem>>, vector<1x128xf32>
    %64 = vector.broadcast %63 : vector<1x128xf32> to vector<192x128xf32>
    %65 = arith.addf %62, %64 : vector<192x128xf32>
    %c0_56 = arith.constant 0 : index
    %c0_57 = arith.constant 0 : index
    %c0_58 = arith.constant 0 : index
    %66 = vector.load %arg7[%c0_56, %c0_57, %c0_58] : memref<1x192x128xbf16, #tpu.memory_space<vmem>>, vector<1x192x128xbf16>
    %67 = vector.shape_cast %66 : vector<1x192x128xbf16> to vector<192x128xbf16>
    %68 = arith.extf %67 : vector<192x128xbf16> to vector<192x128xf32>
    %69 = arith.addf %65, %68 : vector<192x128xf32>
    %cst_59 = arith.constant 0.000000e+00 : f32
    %70 = vector.broadcast %cst_59 : f32 to vector<192x128xf32>
    %71 = arith.maximumf %69, %70 : vector<192x128xf32>
    %72 = arith.truncf %71 : vector<192x128xf32> to vector<192x128xbf16>
    %c0_60 = arith.constant 0 : index
    %c0_61 = arith.constant 0 : index
    %c0_62 = arith.constant 0 : index
    %73 = vector.load %arg8[%c0_60, %c0_61, %c0_62] : memref<1x192x128xbf16, #tpu.memory_space<vmem>>, vector<1x192x128xbf16>
    %74 = vector.shape_cast %73 : vector<1x192x128xbf16> to vector<192x128xbf16>
    %75 = vector.shape_cast %72 : vector<192x128xbf16> to vector<1x192x128xbf16>
    tpu.vector_store %arg8[%c0_60, %c0_61, %c0_62], %75 {strides = array<i32>} : memref<1x192x128xbf16, #tpu.memory_space<vmem>>, vector<1x192x128xbf16>,
    return
  }
  func.func @transform_0(%arg0: i32, %arg1: i32) -> (i32, i32, i32) {
    %c0_i32 = arith.constant 0 : i32
    %c0_i32_0 = arith.constant 0 : i32
    return %arg0, %arg1, %c0_i32 : i32, i32, i32
  }
  func.func @transform_1(%arg0: i32, %arg1: i32) -> (i32, i32, i32) {
    %c0_i32 = arith.constant 0 : i32
    %c0_i32_0 = arith.constant 0 : i32
    %c0_i32_1 = arith.constant 0 : i32
    %c0_i32_2 = arith.constant 0 : i32
    return %c0_i32, %c0_i32_0, %c0_i32_1 : i32, i32, i32
  }
  func.func @transform_2(%arg0: i32, %arg1: i32) -> (i32, i32) {
    %c0_i32 = arith.constant 0 : i32
    %c0_i32_0 = arith.constant 0 : i32
    %c0_i32_1 = arith.constant 0 : i32
    return %c0_i32, %c0_i32_0 : i32, i32
  }
  func.func @transform_3(%arg0: i32, %arg1: i32) -> (i32, i32) {
    %c0_i32 = arith.constant 0 : i32
    %c0_i32_0 = arith.constant 0 : i32
    %c0_i32_1 = arith.constant 0 : i32
    return %c0_i32, %c0_i32_0 : i32, i32
  }
  func.func @transform_4(%arg0: i32, %arg1: i32) -> (i32, i32) {
    %c0_i32 = arith.constant 0 : i32
    %c0_i32_0 = arith.constant 0 : i32
    %c0_i32_1 = arith.constant 0 : i32
    return %c0_i32, %c0_i32_0 : i32, i32
  }
  func.func @transform_5(%arg0: i32, %arg1: i32) -> (i32, i32, i32) {
    %c0_i32 = arith.constant 0 : i32
    %c0_i32_0 = arith.constant 0 : i32
    return %arg0, %arg1, %c0_i32 : i32, i32, i32
  }
  func.func @transform_6(%arg0: i32, %arg1: i32) -> (i32, i32, i32) {
    %c0_i32 = arith.constant 0 : i32
    %c0_i32_0 = arith.constant 0 : i32
    return %arg0, %arg1, %c0_i32 : i32, i32, i32
  }
}

</mosaic_0001>

<bundles_post_ra>
// kernel: bottleneck_forward.2
= control target key start
LH: loop header
LB: loop body
LE: loop exit
PB: predicated region body
PF: predicated region fallthrough
CT: control target
= control target key end

     0   :  { %s1029_s12 = smov 0   ;;  %s1031_s13 = smov 0   ;;  %s1169_s0 = inlined_call_operand.vmem [shape: bf16[768,128], index: 0, kind: input, shape index: {}]   ;;  %s1170_s1 = inlined_call_operand.vmem [shape: bf16[128,128], index: 1, kind: input, shape index: {}]   ;;  %s1171_s2 = inlined_call_operand.vmem [shape: f32[1,128], index: 2, kind: input, shape index: {}]   ;;  %s1172_s3 = inlined_call_operand.vmem [shape: bf16[768,128], index: 3, kind: output, shape index: {}]  }
   0x1   :  { %s1033_s14 = smov 0  }
   0x2 LB: > { %s25_s15 = sadd.s32 1, %s1003_s13  ;;  %p714_p0 = scmp.ge.s32.totalorder %s1007_s14, 1  ;;  %s1007_s14 = sphi %s1033_s14, %s13_s14   ;;  %s1003_s13 = sphi %s1031_s13, %s1174_s13   ;;  %s999_s12 = sphi %s1029_s12, %s1173_s12  }
   0x3   : > { %p27_p1 = scmp.ge.s32.totalorder %s25_s15, 3  ;;  %p169_p2 = scmp.lt.s32.totalorder %s1007_s14, 4 }
   0x5   : > { %s1176_s15 = smov (%p27_p1, %s25_s15), 0  ;;  %p170_p3 = pnand %p714_p0, %p169_p2 }
   0x6   : > { %s715_s24 = sshll.u32 (!%p170_p3), %s999_s12, 5 }
   0x7   : > { %173 = sbr.rel (%p170_p3) target bundleno = 241 (0xf1), region = 32  ;;  %p204_p4 = scmp.lt.s32.totalorder (!%p170_p3), %s715_s24, 95 }
   0xc   : > { %v840_v0 = vld [vmem:[%s1170_s1 + $0x38] sm:$0xff]  ;;  %v839_v1 = vld [vmem:[%s1170_s1 + $0x30] sm:$0xff]  ;;  %v838_v2 = vld [vmem:[%s1170_s1 + $0x28] sm:$0xff]  ;;  %s1178_s24 = smov (!%p204_p4, %s715_s24), 95 }
   0xd   : > { %421 = vmatpush.bf16.msra.mxu0 %v840_v0  ;;  %936 = vmatpush.bf16.msra.mxu1 %v840_v0  ;;  %v837_v3 = vld [vmem:[%s1170_s1 + $0x20] sm:$0xff]  ;;  %v836_v4 = vld [vmem:[%s1170_s1 + $0x18] sm:$0xff]  ;;  %v835_v5 = vld [vmem:[%s1170_s1 + $0x10] sm:$0xff]  ;;  %s716_s4 = sshll.u32 %s1178_s24, 2 }
   0xe   : > { %937 = vmatpush.bf16.msra.mxu2 %v840_v0  ;;  %938 = vmatpush.bf16.msra.mxu3 %v840_v0  ;;  %v834_v6 = vld [vmem:[%s1170_s1 + $0x8] sm:$0xff]  ;;  %v833_v7 = vld [vmem:[%s1170_s1] sm:$0xff]  ;;  %s1082_s9 = scalar_lea.vmem %s1169_s0, %s716_s4  ;;  %s1114_s17 = scalar_lea.vmem %s1172_s3, %s716_s4 }
   0xf   : > { %v817_v8 = vld [vmem:[%s1082_s9] sm:$0xff]  ;;  %v818_v12 = vld [vmem:[%s1082_s9 + $0x8] sm:$0xff]  ;;  %v819_v16 = vld [vmem:[%s1082_s9 + $0x10] sm:$0xff] }
  0x10   : > { %v821_v9 = vld [vmem:[%s1082_s9 + $0x20] sm:$0xff]  ;;  %v822_v13 = vld [vmem:[%s1082_s9 + $0x28] sm:$0xff]  ;;  %v823_v17 = vld [vmem:[%s1082_s9 + $0x30] sm:$0xff] }
  0x11   : > { %422 = vmatpush.bf16.msra.mxu0 %v839_v1  ;;  %939 = vmatpush.bf16.msra.mxu1 %v839_v1  ;;  %v825_v10 = vld [vmem:[%s1082_s9 + $0x40] sm:$0xff]  ;;  %v826_v14 = vld [vmem:[%s1082_s9 + $0x48] sm:$0xff]  ;;  %v827_v18 = vld [vmem:[%s1082_s9 + $0x50] sm:$0xff] }
  0x12   : > { %940 = vmatpush.bf16.msra.mxu2 %v839_v1  ;;  %941 = vmatpush.bf16.msra.mxu3 %v839_v1  ;;  %v829_v11 = vld [vmem:[%s1082_s9 + $0x60] sm:$0xff]  ;;  %v830_v15 = vld [vmem:[%s1082_s9 + $0x68] sm:$0xff]  ;;  %v831_v19 = vld [vmem:[%s1082_s9 + $0x70] sm:$0xff] }
  0x13   : > { %v820_v20 = vld [vmem:[%s1082_s9 + $0x18] sm:$0xff]  ;;  %v1103_v26 = vld [vmem:[%s1171_s2] ss:$0 sm:$0xff] }
  0x14   : > { %v824_v21 = vld [vmem:[%s1082_s9 + $0x38] sm:$0xff] }
  0x15   : > { %423 = vmatpush.bf16.msra.mxu0 %v838_v2  ;;  %942 = vmatpush.bf16.msra.mxu1 %v838_v2  ;;  %v828_v22 = vld [vmem:[%s1082_s9 + $0x58] sm:$0xff] }
  0x16   : > { %943 = vmatpush.bf16.msra.mxu2 %v838_v2  ;;  %944 = vmatpush.bf16.msra.mxu3 %v838_v2  ;;  %v832_v23 = vld [vmem:[%s1082_s9 + $0x78] sm:$0xff] }
  0x19   : > { %424 = vmatpush.bf16.msra.mxu0 %v837_v3  ;;  %945 = vmatpush.bf16.msra.mxu1 %v837_v3 }
  0x1a   : > { %946 = vmatpush.bf16.msra.mxu2 %v837_v3  ;;  %947 = vmatpush.bf16.msra.mxu3 %v837_v3 }
  0x1d   : > { %425 = vmatpush.bf16.msra.mxu0 %v836_v4  ;;  %948 = vmatpush.bf16.msra.mxu1 %v836_v4 }
  0x1e   : > { %949 = vmatpush.bf16.msra.mxu2 %v836_v4  ;;  %950 = vmatpush.bf16.msra.mxu3 %v836_v4 }
  0x21   : > { %426 = vmatpush.bf16.msra.mxu0 %v835_v5  ;;  %951 = vmatpush.bf16.msra.mxu1 %v835_v5 }
  0x22   : > { %952 = vmatpush.bf16.msra.mxu2 %v835_v5  ;;  %953 = vmatpush.bf16.msra.mxu3 %v835_v5 }
  0x25   : > { %427 = vmatpush.bf16.msra.mxu0 %v834_v6  ;;  %954 = vmatpush.bf16.msra.mxu1 %v834_v6 }
  0x26   : > { %955 = vmatpush.bf16.msra.mxu2 %v834_v6  ;;  %956 = vmatpush.bf16.msra.mxu3 %v834_v6 }
  0x29   : > { %428 = vmatpush.bf16.msra.mxu0 %v833_v7  ;;  %957 = vmatpush.bf16.msra.mxu1 %v833_v7 }
  0x2a   : > { %958 = vmatpush.bf16.msra.mxu2 %v833_v7  ;;  %959 = vmatpush.bf16.msra.mxu3 %v833_v7 }
  0x2c   : > { %429 = vmatmul.bf16.vlgmr.msra.gmra.mxu0 %v817_v8  ;;  %449 = vmatmul.bf16.vlgmr.msra.gmra.mxu1 %v821_v9 }
  0x2d   : > { %469 = vmatmul.bf16.vlgmr.msra.gmra.mxu2 %v825_v10  ;;  %489 = vmatmul.bf16.vlgmr.msra.gmra.mxu3 %v829_v11 }
  0x3c   : > { %434 = vmatmul.bf16.gmra.mxu0 %v818_v12  ;;  %454 = vmatmul.bf16.gmra.mxu1 %v822_v13 }
  0x3d   : > { %474 = vmatmul.bf16.gmra.mxu2 %v826_v14  ;;  %494 = vmatmul.bf16.gmra.mxu3 %v830_v15 }
  0x4c   : > { %439 = vmatmul.bf16.gmra.mxu0 %v819_v16  ;;  %459 = vmatmul.bf16.gmra.mxu1 %v823_v17 }
  0x4d   : > { %479 = vmatmul.bf16.gmra.mxu2 %v827_v18  ;;  %499 = vmatmul.bf16.gmra.mxu3 %v831_v19 }
  0x5c   : > { %444 = vmatmul.bf16.gmra.mxu0 %v820_v20  ;;  %464 = vmatmul.bf16.gmra.mxu1 %v824_v21 }
  0x5d   : > { %484 = vmatmul.bf16.gmra.mxu2 %v828_v22  ;;  %504 = vmatmul.bf16.gmra.mxu3 %v832_v23 }
  0xa9   : > { %v430_v24 = vpop.f32.mrf.mxu0  ;;  %v450_v25 = vpop.f32.mrf.mxu1 }
  0xaa   : > { %v431_v27 = vadd.f32 %v1103_v26, %v430_v24  ;;  %v451_v28 = vadd.f32 %v1103_v26, %v450_v25 }
  0xac   : > { %v510_v35 = vmax.f32 %v431_v27, 0.0  ;;  %v518_v36 = vmax.f32 %v451_v28, 0.0 }
  0xb0   : > { %v470_v29 = vpop.f32.mrf.mxu2  ;;  %v490_v30 = vpop.f32.mrf.mxu3 }
  0xb1   : > { %v432_v31 = vpop.f32.mrf.mxu0  ;;  %v452_v32 = vpop.f32.mrf.mxu1  ;;  %v471_v41 = vadd.f32 %v1103_v26, %v470_v29  ;;  %v491_v42 = vadd.f32 %v1103_v26, %v490_v30 }
  0xb2   : > { %v433_v33 = vadd.f32 %v1103_v26, %v432_v31  ;;  %v453_v34 = vadd.f32 %v1103_v26, %v452_v32 }
  0xb3   : > { %v526_v49 = vmax.f32 %v471_v41, 0.0  ;;  %v534_v50 = vmax.f32 %v491_v42, 0.0 }
  0xb4   : > { %v511_v37 = vmax.f32 %v433_v33, 0.0  ;;  %v519_v38 = vmax.f32 %v453_v34, 0.0 }
  0xb6   : > { %v844_v39 = vpack.c.bf16 %v511_v37, %v510_v35  ;;  %v864_v40 = vpack.c.bf16 %v519_v38, %v518_v36 }
  0xb8   : > { %845 = vst [vmem:[%s1114_s17] sm:$0xff] %v844_v39   ;;  %v472_v43 = vpop.f32.mrf.mxu2  ;;  %v492_v44 = vpop.f32.mrf.mxu3 }
  0xb9   : > { %924 = vst [vmem:[%s1114_s17 + $0x20] sm:$0xff] %v864_v40   ;;  %v473_v45 = vadd.f32 %v1103_v26, %v472_v43  ;;  %v493_v46 = vadd.f32 %v1103_v26, %v492_v44  ;;  %v435_v47 = vpop.f32.mrf.mxu0  ;;  %v455_v48 = vpop.f32.mrf.mxu1 }
  0xba   : > { %v436_v55 = vadd.f32 %v1103_v26, %v435_v47  ;;  %v456_v56 = vadd.f32 %v1103_v26, %v455_v48 }
  0xbb   : > { %v527_v51 = vmax.f32 %v473_v45, 0.0  ;;  %v535_v52 = vmax.f32 %v493_v46, 0.0 }
  0xbc   : > { %v512_v63 = vmax.f32 %v436_v55, 0.0  ;;  %v520_v0 = vmax.f32 %v456_v56, 0.0 }
  0xbd   : > { %v884_v53 = vpack.c.bf16 %v527_v51, %v526_v49  ;;  %v904_v54 = vpack.c.bf16 %v535_v52, %v534_v50 }
  0xbf   : > { %928 = vst [vmem:[%s1114_s17 + $0x40] sm:$0xff] %v884_v53  }
  0xc0   : > { %932 = vst [vmem:[%s1114_s17 + $0x60] sm:$0xff] %v904_v54   ;;  %v475_v57 = vpop.f32.mrf.mxu2  ;;  %v495_v58 = vpop.f32.mrf.mxu3 }
  0xc1   : > { %v437_v59 = vpop.f32.mrf.mxu0  ;;  %v457_v60 = vpop.f32.mrf.mxu1  ;;  %v476_v5 = vadd.f32 %v1103_v26, %v475_v57  ;;  %v496_v6 = vadd.f32 %v1103_v26, %v495_v58 }
  0xc2   : > { %v438_v61 = vadd.f32 %v1103_v26, %v437_v59  ;;  %v458_v62 = vadd.f32 %v1103_v26, %v457_v60 }
  0xc3   : > { %v528_v13 = vmax.f32 %v476_v5, 0.0  ;;  %v536_v14 = vmax.f32 %v496_v6, 0.0 }
  0xc4   : > { %v513_v1 = vmax.f32 %v438_v61, 0.0  ;;  %v521_v2 = vmax.f32 %v458_v62, 0.0 }
  0xc6   : > { %v849_v3 = vpack.c.bf16 %v513_v1, %v512_v63  ;;  %v869_v4 = vpack.c.bf16 %v521_v2, %v520_v0 }
  0xc8   : > { %921 = vst [vmem:[%s1114_s17 + $0x8] sm:$0xff] %v849_v3   ;;  %v477_v7 = vpop.f32.mrf.mxu2  ;;  %v497_v8 = vpop.f32.mrf.mxu3 }
  0xc9   : > { %925 = vst [vmem:[%s1114_s17 + $0x28] sm:$0xff] %v869_v4   ;;  %v478_v9 = vadd.f32 %v1103_v26, %v477_v7  ;;  %v498_v10 = vadd.f32 %v1103_v26, %v497_v8  ;;  %v440_v11 = vpop.f32.mrf.mxu0  ;;  %v460_v12 = vpop.f32.mrf.mxu1 }
  0xca   : > { %v441_v19 = vadd.f32 %v1103_v26, %v440_v11  ;;  %v461_v20 = vadd.f32 %v1103_v26, %v460_v12 }
  0xcb   : > { %v529_v15 = vmax.f32 %v478_v9, 0.0  ;;  %v537_v16 = vmax.f32 %v498_v10, 0.0 }
  0xcc   : > { %v514_v28 = vmax.f32 %v441_v19, 0.0  ;;  %v522_v29 = vmax.f32 %v461_v20, 0.0 }
  0xcd   : > { %v889_v17 = vpack.c.bf16 %v529_v15, %v528_v13  ;;  %v909_v18 = vpack.c.bf16 %v537_v16, %v536_v14 }
  0xcf   : > { %929 = vst [vmem:[%s1114_s17 + $0x48] sm:$0xff] %v889_v17  }
  0xd0   : > { %933 = vst [vmem:[%s1114_s17 + $0x68] sm:$0xff] %v909_v18   ;;  %v480_v21 = vpop.f32.mrf.mxu2  ;;  %v500_v22 = vpop.f32.mrf.mxu3 }
  0xd1   : > { %v442_v23 = vpop.f32.mrf.mxu0  ;;  %v462_v24 = vpop.f32.mrf.mxu1  ;;  %v481_v34 = vadd.f32 %v1103_v26, %v480_v21  ;;  %v501_v35 = vadd.f32 %v1103_v26, %v500_v22 }
  0xd2   : > { %v443_v25 = vadd.f32 %v1103_v26, %v442_v23  ;;  %v463_v27 = vadd.f32 %v1103_v26, %v462_v24 }
  0xd3   : > { %v530_v42 = vmax.f32 %v481_v34, 0.0  ;;  %v538_v43 = vmax.f32 %v501_v35, 0.0 }
  0xd4   : > { %v515_v30 = vmax.f32 %v443_v25, 0.0  ;;  %v523_v31 = vmax.f32 %v463_v27, 0.0 }
  0xd6   : > { %v854_v32 = vpack.c.bf16 %v515_v30, %v514_v28  ;;  %v874_v33 = vpack.c.bf16 %v523_v31, %v522_v29 }
  0xd8   : > { %922 = vst [vmem:[%s1114_s17 + $0x10] sm:$0xff] %v854_v32   ;;  %v482_v36 = vpop.f32.mrf.mxu2  ;;  %v502_v37 = vpop.f32.mrf.mxu3 }
  0xd9   : > { %926 = vst [vmem:[%s1114_s17 + $0x30] sm:$0xff] %v874_v33   ;;  %v483_v38 = vadd.f32 %v1103_v26, %v482_v36  ;;  %v503_v39 = vadd.f32 %v1103_v26, %v502_v37  ;;  %v445_v40 = vpop.f32.mrf.mxu0  ;;  %v465_v41 = vpop.f32.mrf.mxu1 }
  0xda   : > { %v446_v48 = vadd.f32 %v1103_v26, %v445_v40  ;;  %v466_v49 = vadd.f32 %v1103_v26, %v465_v41 }
  0xdb   : > { %v531_v44 = vmax.f32 %v483_v38, 0.0  ;;  %v539_v45 = vmax.f32 %v503_v39, 0.0 }
  0xdc   : > { %v516_v56 = vmax.f32 %v446_v48, 0.0  ;;  %v524_v57 = vmax.f32 %v466_v49, 0.0 }
  0xdd   : > { %v894_v46 = vpack.c.bf16 %v531_v44, %v530_v42  ;;  %v914_v47 = vpack.c.bf16 %v539_v45, %v538_v43 }
  0xdf   : > { %930 = vst [vmem:[%s1114_s17 + $0x50] sm:$0xff] %v894_v46  }
  0xe0   : > { %934 = vst [vmem:[%s1114_s17 + $0x70] sm:$0xff] %v914_v47   ;;  %v485_v50 = vpop.f32.mrf.mxu2  ;;  %v505_v51 = vpop.f32.mrf.mxu3 }
  0xe1   : > { %v447_v52 = vpop.f32.mrf.mxu0  ;;  %v467_v53 = vpop.f32.mrf.mxu1  ;;  %v486_v62 = vadd.f32 %v1103_v26, %v485_v50  ;;  %v506_v63 = vadd.f32 %v1103_v26, %v505_v51 }
  0xe2   : > { %v448_v54 = vadd.f32 %v1103_v26, %v447_v52  ;;  %v468_v55 = vadd.f32 %v1103_v26, %v467_v53 }
  0xe3   : > { %v532_v4 = vmax.f32 %v486_v62, 0.0  ;;  %v540_v5 = vmax.f32 %v506_v63, 0.0 }
  0xe4   : > { %v517_v58 = vmax.f32 %v448_v54, 0.0  ;;  %v525_v59 = vmax.f32 %v468_v55, 0.0 }
  0xe6   : > { %v859_v60 = vpack.c.bf16 %v517_v58, %v516_v56  ;;  %v879_v61 = vpack.c.bf16 %v525_v59, %v524_v57 }
  0xe8   : > { %923 = vst [vmem:[%s1114_s17 + $0x18] sm:$0xff] %v859_v60   ;;  %v487_v0 = vpop.f32.mrf.mxu2  ;;  %v507_v1 = vpop.f32.mrf.mxu3 }
  0xe9   : > { %927 = vst [vmem:[%s1114_s17 + $0x38] sm:$0xff] %v879_v61   ;;  %v488_v2 = vadd.f32 %v1103_v26, %v487_v0  ;;  %v508_v3 = vadd.f32 %v1103_v26, %v507_v1 }
  0xeb   : > { %v533_v6 = vmax.f32 %v488_v2, 0.0  ;;  %v541_v7 = vmax.f32 %v508_v3, 0.0 }
  0xed   : > { %v899_v8 = vpack.c.bf16 %v533_v6, %v532_v4  ;;  %v919_v9 = vpack.c.bf16 %v541_v7, %v540_v5 }
  0xef   : > { %931 = vst [vmem:[%s1114_s17 + $0x58] sm:$0xff] %v899_v8  }
  0xf0   : > { %935 = vst [vmem:[%s1114_s17 + $0x78] sm:$0xff] %v919_v9  }
  0xf1 PF: > { %s13_s14 = sadd.s32 1, %s1007_s14   ;;  %s1173_s12 = smov %s1003_s13 }
  0xf2   : > { %p10_p5 = scmp.ge.s32.totalorder %s13_s14, 5   ;;  %s1174_s13 = smov %s1176_s15 }
  0xf4   :  { %12 = sbr.rel (!%p10_p5) target bundleno = 2 (0x2), region = 68 }

// kernel: bottleneck_forward.3
= control target key start
LH: loop header
LB: loop body
LE: loop exit
PB: predicated region body
PF: predicated region fallthrough
CT: control target
= control target key end

     0   :  { %s4188_s21 = smov 0   ;;  %s4190_s22 = smov 0   ;;  %s5021_s0 = inlined_call_operand.vmem [shape: bf16[2,528,128], index: 0, kind: input, shape index: {}]   ;;  %s5022_s1 = inlined_call_operand.vmem [shape: bf16[9,128,128], index: 1, kind: input, shape index: {}]   ;;  %s5023_s2 = inlined_call_operand.vmem [shape: f32[1,128], index: 2, kind: input, shape index: {}]   ;;  %s5024_s3 = inlined_call_operand.vmem [shape: bf16[128,128], index: 3, kind: input, shape index: {}]   ;;  %s5025_s4 = inlined_call_operand.vmem [shape: f32[1,128], index: 4, kind: input, shape index: {}]   ;;  %s5026_s5 = inlined_call_operand.vmem [shape: bf16[2,384,128], index: 5, kind: input, shape index: {}]   ;;  %s5027_s6 = inlined_call_operand.vmem [shape: bf16[2,384,128], index: 6, kind: output, shape index: {}]  }
   0x1   :  { %s4192_s23 = smov 0   ;;  %s4194_s24 = smov 0  }
   0x2   :  { %s4196_s25 = smov 0  }
   0x3 LB: > { %s25_s26 = sadd.s32 1, %s4143_s23  ;;  %s28_s27 = sadd.s32 1, %s4147_s24  ;;  %s4151_s25 = sphi %s4196_s25, %s16_s25   ;;  %s4147_s24 = sphi %s4194_s24, %s5031_s24   ;;  %s4143_s23 = sphi %s4192_s23, %s5030_s23   ;;  %s4139_s22 = sphi %s4190_s22, %s5029_s22   ;;  %s4135_s21 = sphi %s4188_s21, %s5028_s21  }
   0x4   : > { %p26_p0 = scmp.ge.s32.totalorder %s25_s26, 2  ;;  %p3086_p1 = scmp.ge.s32.totalorder %s4151_s25, 1 }
   0x5   : > { %p250_p2 = scmp.lt.s32.totalorder %s4151_s25, 5 }
   0x6   : > { %s5033_s26 = smov (%p26_p0, %s25_s26), 0  ;;  %s5035_s27 = smov (!%p26_p0, %s28_s27), %s4147_s24 }
   0x7   : > { %p251_p3 = pnand %p3086_p1, %p250_p2  ;;  %p30_p4 = scmp.ge.s32.totalorder %s5035_s27, 2 }
   0x8   : > { %s297_s8 = smul.u32 (!%p251_p3), 33, %s4135_s21  ;;  %p298_p5 = scmp.lt.s32.totalorder (!%p251_p3), %s4139_s22, 1 }
   0x9   : > { %s5037_s27 = smov (%p30_p4, %s5035_s27), 0  ;;  %254 = sbr.rel (%p251_p3) target bundleno = 805 (0x325), region = 44 }
   0xa   : > { %p300_p6 = scmp.lt.s32.totalorder (!%p251_p3), %s297_s8, 65 }
   0xe   : > { %v3794_v0 = vld [vmem:[%s5022_s1 + $0x78] sm:$0xff]  ;;  %v3793_v2 = vld [vmem:[%s5022_s1 + $0x70] sm:$0xff]  ;;  %s5039_s22 = smov (!%p298_p5, %s4139_s22), 1  ;;  %s5041_s8 = smov (!%p300_p6, %s297_s8), 65  ;;  %v3792_v4 = vld [vmem:[%s5022_s1 + $0x68] sm:$0xff]  ;;  %vm828_vm1 = vcmask 1046528  }
   0xf   : > { %v3786_v1 = vld [vmem:[%s5022_s1 + $0x38] sm:$0xff]  ;;  %4050 = vmatpush.bf16.msra.mxu2 %v3794_v0  ;;  %v3785_v3 = vld [vmem:[%s5022_s1 + $0x30] sm:$0xff]  ;;  %609 = vmatpush.bf16.msra.mxu0 %v3794_v0  ;;  %s4066_s13 = smul.u32 66, %s5039_s22  ;;  %v3784_v5 = vld [vmem:[%s5022_s1 + $0x28] sm:$0xff]  ;;  %vm448_vm0 = vsmask.f32 7424 }
  0x10   : > { %4058 = vmatpush.bf16.msra.mxu3 %v3786_v1  ;;  %738 = vmatpush.bf16.msra.mxu1 %v3786_v1  ;;  %v3791_v6 = vld [vmem:[%s5022_s1 + $0x60] sm:$0xff]  ;;  %v3790_v8 = vld [vmem:[%s5022_s1 + $0x58] sm:$0xff]  ;;  %v3789_v12 = vld [vmem:[%s5022_s1 + $0x50] sm:$0xff] }
  0x11   : > { %s303_s18 = sadd.s32 %s4066_s13, %s5041_s8  ;;  %v3783_v7 = vld [vmem:[%s5022_s1 + $0x20] sm:$0xff]  ;;  %v3782_v9 = vld [vmem:[%s5022_s1 + $0x18] sm:$0xff]  ;;  %v3781_v13 = vld [vmem:[%s5022_s1 + $0x10] sm:$0xff] }
  0x12   : > { %s3087_s19 = sshll.u32 %s303_s18, 2  ;;  %v3788_v18 = vld [vmem:[%s5022_s1 + $0x48] sm:$0xff]  ;;  %v3787_v26 = vld [vmem:[%s5022_s1 + $0x40] sm:$0xff]  ;;  %v3802_v32 = vld [vmem:[%s5022_s1 + $0xb8] sm:$0xff] }
  0x13   : > { %4051 = vmatpush.bf16.msra.mxu2 %v3793_v2  ;;  %610 = vmatpush.bf16.msra.mxu0 %v3793_v2  ;;  %s4251_s10 = scalar_lea.vmem %s5021_s0, %s3087_s19  ;;  %v3780_v19 = vld [vmem:[%s5022_s1 + $0x8] sm:$0xff]  ;;  %v3779_v27 = vld [vmem:[%s5022_s1] sm:$0xff]  ;;  %v3822_v33 = vld [vmem:[%s5022_s1 + $0xf8] sm:$0xff] }
  0x14   : > { %4059 = vmatpush.bf16.msra.mxu3 %v3785_v3  ;;  %739 = vmatpush.bf16.msra.mxu1 %v3785_v3  ;;  %v4260_v10 = vld [vmem:[%s4251_s10 + $0x30] sm:$0xff]  ;;  %v3906_v11 = vld [vmem:[%s4251_s10] sm:$0xff]   ;;  %v4270_v14 = vld [vmem:[%s4251_s10 + $0x38] sm:$0xff] }
  0x15   : > { %v497_v15 = vshll.u32 %v4260_v10, 16  ;;  %v4274_v16 = vld [vmem:[%s4251_s10 + $0x8] sm:$0xff]  ;;  %v452_v17 = vshll.u32 %v3906_v11, 16  ;;  %v501_v21 = vshrl.u32 %v4260_v10, 16  ;;  %v505_v22 = vshll.u32 %v4270_v14, 16  ;;  %v3841_v36 = vld [vmem:[%s5022_s1 + $0x138] sm:$0xff] }
  0x16   : > { %v450_v23 = vshrl.u32 %v3906_v11, 16  ;;  %v457_v25 = vshll.u32 %v4274_v16, 16  ;;  %v3801_v37 = vld [vmem:[%s5022_s1 + $0xb0] sm:$0xff]  ;;  %v4313_v39 = vld [vmem:[%s4251_s10 + $0x40] sm:$0xff]  ;;  %v3800_v42 = vld [vmem:[%s5022_s1 + $0xa8] sm:$0xff]  ;;  %v509_v44 = vshrl.u32 %v4270_v14, 16 }
  0x17   : > { %4052 = vmatpush.bf16.msra.mxu2 %v3792_v4  ;;  %611 = vmatpush.bf16.msra.mxu0 %v3792_v4  ;;  %v4282_v20 = vrot.slane %v497_v15, 1  ;;  %v454_v24 = vrot.slane %v452_v17, 1  ;;  %v507_v29 = vrot.slane %v505_v22, 1  ;;  %v3821_v38 = vld [vmem:[%s5022_s1 + $0xf0] sm:$0xff]  ;;  %v3820_v43 = vld [vmem:[%s5022_s1 + $0xe8] sm:$0xff]  ;;  %v513_v45 = vshll.u32 %v4313_v39, 16 }
  0x18   : > { %4060 = vmatpush.bf16.msra.mxu3 %v3784_v5  ;;  %740 = vmatpush.bf16.msra.mxu1 %v3784_v5  ;;  %v459_v31 = vrot.slane %v457_v25, 1  ;;  %v4316_v40 = vld [vmem:[%s4251_s10 + $0x10] sm:$0xff]  ;;  %v461_v46 = vshrl.u32 %v4274_v16, 16  ;;  %v3839_v48 = vld [vmem:[%s5022_s1 + $0x128] sm:$0xff]  ;;  %v3799_v49 = vld [vmem:[%s5022_s1 + $0xa0] sm:$0xff]  ;;  %v517_v1 = vshrl.u32 %v4313_v39, 16 }
  0x19   : > { %v503_v28 = vor.u32 %v501_v21, %v4282_v20  ;;  %v455_v30 = vor.u32 %v454_v24, %v450_v23  ;;  %v3840_v41 = vld [vmem:[%s5022_s1 + $0x130] sm:$0xff]  ;;  %v465_v47 = vshll.u32 %v4316_v40, 16  ;;  %v3819_v50 = vld [vmem:[%s5022_s1 + $0xe0] sm:$0xff]  ;;  %v511_v51 = vor.u32 %v509_v44, %v507_v29  ;;  %v3798_v58 = vld [vmem:[%s5022_s1 + $0x98] sm:$0xff] }
  0x1a   : > { %v515_v52 = vrot.slane %v513_v45, 1  ;;  %v463_v53 = vor.u32 %v461_v46, %v459_v31  ;;  %v3838_v55 = vld [vmem:[%s5022_s1 + $0x120] sm:$0xff]  ;;  %v4351_v59 = vld [vmem:[%s4251_s10 + $0x48] sm:$0xff]  ;;  %v3818_v60 = vld [vmem:[%s5022_s1 + $0xd8] sm:$0xff]  ;;  %v469_v3 = vshrl.u32 %v4316_v40, 16 }
  0x1b   : > { %4053 = vmatpush.bf16.msra.mxu2 %v3791_v6  ;;  %612 = vmatpush.bf16.msra.mxu0 %v3791_v6  ;;  %v508_v34 = vsel %vm448_vm0, %v503_v28, %v507_v29  ;;  %v460_v35 = vsel %vm448_vm0, %v455_v30, %v459_v31  ;;  %v467_v54 = vrot.slane %v465_v47, 1  ;;  %v3837_v61 = vld [vmem:[%s5022_s1 + $0x118] sm:$0xff]  ;;  %v3797_v63 = vld [vmem:[%s5022_s1 + $0x90] sm:$0xff]  ;;  %v521_v2 = vshll.u32 %v4351_v59, 16  ;;  %v3796_v15 = vld [vmem:[%s5022_s1 + $0x88] sm:$0xff] }
  0x1c   : > { %4061 = vmatpush.bf16.msra.mxu3 %v3783_v7  ;;  %741 = vmatpush.bf16.msra.mxu1 %v3783_v7  ;;  %v516_v56 = vsel %vm448_vm0, %v511_v51, %v515_v52  ;;  %v4360_v62 = vld [vmem:[%s4251_s10 + $0x18] sm:$0xff]  ;;  %v3817_v0 = vld [vmem:[%s5022_s1 + $0xd0] sm:$0xff]  ;;  %v519_v5 = vor.u32 %v517_v1, %v515_v52  ;;  %v3816_v17 = vld [vmem:[%s5022_s1 + $0xc8] sm:$0xff]  ;;  %v525_v21 = vshrl.u32 %v4351_v59, 16 }
  0x1d   : > { %v468_v57 = vsel %vm448_vm0, %v463_v53, %v467_v54  ;;  %v473_v4 = vshll.u32 %v4360_v62, 16  ;;  %v523_v6 = vrot.slane %v521_v2, 1  ;;  %v471_v7 = vor.u32 %v469_v3, %v467_v54  ;;  %v3848_v31 = vld [vmem:[%s5022_s1 + $0x170] sm:$0xff]  ;;  %v3846_v45 = vld [vmem:[%s5022_s1 + $0x160] sm:$0xff]  ;;  %v3845_v51 = vld [vmem:[%s5022_s1 + $0x158] sm:$0xff] }
  0x1e   : > { %v477_v23 = vshrl.u32 %v4360_v62, 16  ;;  %v3842_v2 = vld [vmem:[%s5022_s1 + $0x140] sm:$0xff]  ;;  %v1261_v3 = vld [vmem:[%s4251_s10 + $0xc] sm:$0xff]  }
  0x1f   : > { %4054 = vmatpush.bf16.msra.mxu2 %v3790_v8  ;;  %613 = vmatpush.bf16.msra.mxu0 %v3790_v8  ;;  %v475_v8 = vrot.slane %v473_v4, 1  ;;  %v527_v25 = vor.u32 %v525_v21, %v523_v6  ;;  %v4110_v4 = vld [vmem:[%s4251_s10 + $0xc] sm:$0xf0]  ;;  %v3823_v21 = vld [vmem:[%s4251_s10 + $0x14] sm:$0xff] }
  0x20   : > { %4062 = vmatpush.bf16.msra.mxu3 %v3782_v9  ;;  %742 = vmatpush.bf16.msra.mxu1 %v3782_v9  ;;  %v524_v9 = vsel %vm448_vm0, %v519_v5, %v523_v6 }
  0x23   : > { %4055 = vmatpush.bf16.msra.mxu2 %v3789_v12  ;;  %614 = vmatpush.bf16.msra.mxu0 %v3789_v12  ;;  %v4376_v12 = vld [vmem:[%s4251_s10 + $0x50] sm:$0xff] }
  0x24   : > { %4063 = vmatpush.bf16.msra.mxu3 %v3781_v13  ;;  %743 = vmatpush.bf16.msra.mxu1 %v3781_v13  ;;  %v3836_v13 = vld [vmem:[%s5022_s1 + $0x110] sm:$0xff]  ;;  %v529_v22 = vshll.u32 %v4376_v12, 16 }
  0x27   : > { %4056 = vmatpush.bf16.msra.mxu2 %v3788_v18  ;;  %615 = vmatpush.bf16.msra.mxu0 %v3788_v18  ;;  %v4389_v18 = vld [vmem:[%s4251_s10 + $0x20] sm:$0xff] }
  0x28   : > { %4064 = vmatpush.bf16.msra.mxu3 %v3780_v19  ;;  %744 = vmatpush.bf16.msra.mxu1 %v3780_v19  ;;  %v3849_v19 = vld [vmem:[%s5022_s1 + $0x178] sm:$0xff]  ;;  %v481_v24 = vshll.u32 %v4389_v18, 16 }
  0x2a   : > { %v483_v28 = vrot.slane %v481_v24, 1 }
  0x2b   : > { %4057 = vmatpush.bf16.msra.mxu2 %v3787_v26  ;;  %616 = vmatpush.bf16.msra.mxu0 %v3787_v26  ;;  %v531_v26 = vrot.slane %v529_v22, 1 }
  0x2c   : > { %4065 = vmatpush.bf16.msra.mxu3 %v3779_v27  ;;  %745 = vmatpush.bf16.msra.mxu1 %v3779_v27  ;;  %v479_v27 = vor.u32 %v477_v23, %v475_v8  ;;  %v1367_v23 = vshrl.u32 %v1261_v3, 16 }
  0x2d   : > { %v532_v29 = vsel %vm448_vm0, %v527_v25, %v531_v26  ;;  %v1374_v25 = vshll.u32 %v3823_v21, 16 }
  0x2e   : > { %647 = vmatmul.bf16.vlgmr.msra.gmra.mxu2 %v508_v34  ;;  %617 = vmatmul.bf16.vlgmr.msra.gmra.mxu0 %v460_v35  ;;  %v484_v30 = vsel %vm448_vm0, %v479_v27, %v483_v28  ;;  %v3795_v34 = vld [vmem:[%s5022_s1 + $0x80] sm:$0xff]  ;;  %v4415_v35 = vld [vmem:[%s4251_s10 + $0x28] sm:$0xff] }
  0x2f   : > { %914 = vmatpush.bf16.msrb.mxu2 %v3802_v32  ;;  %776 = vmatmul.bf16.vlgmr.msra.gmra.mxu3 %v4260_v10  ;;  %v4406_v32 = vld [vmem:[%s4251_s10 + $0x58] sm:$0xff]  ;;  %v489_v44 = vshll.u32 %v4415_v35, 16  ;;  %v493_v1 = vshrl.u32 %v4415_v35, 16 }
  0x30   : > { %1168 = vmatpush.bf16.msrb.mxu3 %v3822_v33  ;;  %746 = vmatmul.bf16.vlgmr.msra.gmra.mxu1 %v3906_v11  ;;  %v476_v11 = vsel %vm448_vm0, %v471_v7, %v475_v8  ;;  %v3835_v33 = vld [vmem:[%s5022_s1 + $0x108] sm:$0xff] }
  0x31   : > { %1526 = vmatpush.bf16.msrb.mxu0 %v3841_v36  ;;  %1725 = vmatpush.bf16.msrb.mxu1 %v3849_v19  ;;  %v3847_v36 = vld [vmem:[%s5022_s1 + $0x168] sm:$0xff]  ;;  %v4022_v19 = vld [vmem:[%s4251_s10] sm:$0xe] }
  0x33   : > { %915 = vmatpush.bf16.msrb.mxu2 %v3801_v37  ;;  %v3815_v37 = vld [vmem:[%s5022_s1 + $0xc0] sm:$0xff] }
  0x34   : > { %1169 = vmatpush.bf16.msrb.mxu3 %v3821_v38  ;;  %v3834_v38 = vld [vmem:[%s5022_s1 + $0x100] sm:$0xff] }
  0x35   : > { %1527 = vmatpush.bf16.msrb.mxu0 %v3840_v41  ;;  %1726 = vmatpush.bf16.msrb.mxu1 %v3848_v31  ;;  %v533_v41 = vshrl.u32 %v4376_v12, 16 }
  0x37   : > { %916 = vmatpush.bf16.msrb.mxu2 %v3800_v42  ;;  %v537_v42 = vshll.u32 %v4406_v32, 16  ;;  %v535_v46 = vor.u32 %v533_v41, %v531_v26  ;;  %v3824_v41 = vld [vmem:[%s4251_s10 + $0x1c] sm:$0xff] }
  0x38   : > { %1170 = vmatpush.bf16.msrb.mxu3 %v3820_v43  ;;  %v485_v43 = vshrl.u32 %v4389_v18, 16 }
  0x39   : > { %1528 = vmatpush.bf16.msrb.mxu0 %v3839_v48  ;;  %1727 = vmatpush.bf16.msrb.mxu1 %v3847_v36  ;;  %v539_v47 = vrot.slane %v537_v42, 1  ;;  %v1378_v42 = vshrl.u32 %v3823_v21, 16 }
  0x3a   : > { %v487_v48 = vor.u32 %v485_v43, %v483_v28  ;;  %v830_v28 = vrot.slane %v4274_v16, 1  ;;  %v1382_v43 = vshll.u32 %v3824_v41, 16 }
  0x3b   : > { %917 = vmatpush.bf16.msrb.mxu2 %v3799_v49  ;;  %v491_v49 = vrot.slane %v489_v44, 1  ;;  %v540_v52 = vsel %vm448_vm0, %v535_v46, %v539_v47  ;;  %v832_v44 = vrot.slane %v4316_v40, 1 }
  0x3c   : > { %1171 = vmatpush.bf16.msrb.mxu3 %v3819_v50  ;;  %v367_v50 = vld [vmem:[%s4251_s10 + $0x60] sm:$0x1]  ;;  %v1384_v46 = vrot.slane %v1382_v43, 1 }
  0x3d   : > { %1529 = vmatpush.bf16.msrb.mxu0 %v3838_v55  ;;  %1728 = vmatpush.bf16.msrb.mxu1 %v3846_v45  ;;  %v434_v53 = vunpack.c.l.b16 %v367_v50  ;;  %v492_v54 = vsel %vm448_vm0, %v487_v48, %v491_v49  ;;  %v3844_v55 = vld [vmem:[%s5022_s1 + $0x150] sm:$0xff]  ;;  %v495_v7 = vor.u32 %v493_v1, %v491_v49  ;;  %v833_v49 = vsel %vm828_vm1, %v830_v28, %v832_v44 }
  0x3e   : > { %652 = vmatmul.bf16.gmra.mxu2 %v516_v56  ;;  %622 = vmatmul.bf16.gmra.mxu0 %v468_v57  ;;  %v3869_v56 = vld [vmem:[%s5022_s1 + $0x1b8] sm:$0xff] }
  0x3f   : > { %781 = vmatmul.bf16.gmra.mxu3 %v4270_v14  ;;  %918 = vmatpush.bf16.msrb.mxu2 %v3798_v58  ;;  %v4447_v57 = vpack.c.b16 %v434_v53, %v434_v53  ;;  %v3888_v58 = vld [vmem:[%s5022_s1 + $0x1f8] sm:$0xff]  ;;  %v3825_v53 = vld [vmem:[%s4251_s10 + $0x24] sm:$0xff] }
  0x40   : > { %751 = vmatmul.bf16.gmra.mxu1 %v4274_v16  ;;  %1172 = vmatpush.bf16.msrb.mxu3 %v3818_v60  ;;  %v3843_v60 = vld [vmem:[%s5022_s1 + $0x148] sm:$0xff]  ;;  %v3895_v16 = vld [vmem:[%s5022_s1 + $0x230] sm:$0xff] }
  0x41   : > { %1530 = vmatpush.bf16.msrb.mxu0 %v3837_v61  ;;  %1729 = vmatpush.bf16.msrb.mxu1 %v3845_v51  ;;  %v3896_v61 = vld [vmem:[%s5022_s1 + $0x238] sm:$0xff] }
  0x42   : > { %v3804_v48 = vld [vmem:[%s4251_s10 + $0x14] sm:$0xff] }
  0x43   : > { %919 = vmatpush.bf16.msrb.mxu2 %v3797_v63  ;;  %v541_v63 = vshrl.u32 %v4406_v32, 16 }
  0x44   : > { %1173 = vmatpush.bf16.msrb.mxu3 %v3817_v0  ;;  %v545_v0 = vshll.u32 %v4447_v57, 16 }
  0x45   : > { %1531 = vmatpush.bf16.msrb.mxu0 %v3836_v13  ;;  %1730 = vmatpush.bf16.msrb.mxu1 %v3844_v55  ;;  %v543_v5 = vor.u32 %v541_v63, %v539_v47  ;;  %v3868_v13 = vld [vmem:[%s5022_s1 + $0x1b0] sm:$0xff]  ;;  %v1643_v47 = vrot.slane %v3824_v41, 1  ;;  %v1390_v55 = vshll.u32 %v3825_v53, 16  ;;  %v1645_v63 = vrot.slane %v3825_v53, 1 }
  0x46   : > { %v547_v6 = vrot.slane %v545_v0, 1  ;;  %v3805_v0 = vld [vmem:[%s4251_s10 + $0x1c] sm:$0xff] }
  0x47   : > { %920 = vmatpush.bf16.msrb.mxu2 %v3796_v15  ;;  %v3887_v15 = vld [vmem:[%s5022_s1 + $0x1f0] sm:$0xff] }
  0x48   : > { %1174 = vmatpush.bf16.msrb.mxu3 %v3816_v17  ;;  %v548_v8 = vsel %vm448_vm0, %v543_v5, %v547_v6  ;;  %v4021_v17 = vld [vmem:[%s4251_s10] sm:$0xf0]  ;;  %v1646_v5 = vsel %vm828_vm1, %v1643_v47, %v1645_v63 }
  0x49   : > { %1532 = vmatpush.bf16.msrb.mxu0 %v3835_v33  ;;  %1731 = vmatpush.bf16.msrb.mxu1 %v3843_v60  ;;  %v4023_v22 = vor.u32 %v4022_v19, %v4021_v17  ;;  %v1641_v33 = vrot.slane %v3823_v21, 1  ;;  %v3866_v21 = vld [vmem:[%s5022_s1 + $0x1a0] sm:$0xff] }
  0x4b   : > { %921 = vmatpush.bf16.msrb.mxu2 %v3795_v34  ;;  %v829_v27 = vrot.slane %v4023_v22, 1  ;;  %v3803_v34 = vld [vmem:[%s4251_s10 + $0xc] sm:$0xff]  ;;  %v1644_v51 = vsel %vm828_vm1, %v1641_v33, %v1643_v47  ;;  %v836_v22 = vrot.slane %v4389_v18, 1 }
  0x4c   : > { %1175 = vmatpush.bf16.msrb.mxu3 %v3815_v37 }
  0x4d   : > { %1533 = vmatpush.bf16.msrb.mxu0 %v3834_v38  ;;  %1732 = vmatpush.bf16.msrb.mxu1 %v3842_v2  ;;  %v831_v36 = vsel %vm828_vm1, %v829_v27, %v830_v28 }
  0x4e   : > { %657 = vmatmul.bf16.gmra.mxu2 %v524_v9  ;;  %627 = vmatmul.bf16.gmra.mxu0 %v476_v11  ;;  %v500_v9 = vsel %vm448_vm0, %v495_v7, %v4282_v20  ;;  %v4111_v11 = vld [vmem:[%s4251_s10 + $0xc] sm:$0xe]  ;;  %v1369_v20 = vshll.u32 %v1261_v3, 16 }
  0x4f   : > { %786 = vmatmul.bf16.gmra.mxu3 %v4313_v39  ;;  %1979 = vmatpush.bf16.msra.mxu2 %v3869_v56  ;;  %v4112_v26 = vor.u32 %v4111_v11, %v4110_v4  ;;  %v3894_v56 = vld [vmem:[%s5022_s1 + $0x228] sm:$0xff] }
  0x50   : > { %756 = vmatmul.bf16.gmra.mxu1 %v4316_v40  ;;  %2337 = vmatpush.bf16.msra.mxu3 %v3888_v58  ;;  %v1371_v24 = vrot.slane %v1369_v20, 1  ;;  %v3886_v40 = vld [vmem:[%s5022_s1 + $0x1e8] sm:$0xff]  ;;  %v834_v58 = vrot.slane %v4360_v62, 1  ;;  %v3885_v20 = vld [vmem:[%s5022_s1 + $0x1e0] sm:$0xff] }
  0x51   : > { %2536 = vmatpush.bf16.msra.mxu0 %v3896_v61  ;;  %v1640_v31 = vrot.slane %v4112_v26, 1  ;;  %v1392_v61 = vrot.slane %v1390_v55, 1 }
  0x52   : > { %v835_v1 = vsel %vm828_vm1, %v832_v44, %v834_v58 }
  0x53   : > { %1980 = vmatpush.bf16.msra.mxu2 %v3868_v13  ;;  %v1642_v38 = vsel %vm828_vm1, %v1640_v31, %v1641_v33 }
  0x54   : > { %2338 = vmatpush.bf16.msra.mxu3 %v3887_v15  ;;  %v1394_v15 = vshrl.u32 %v3825_v53, 16 }
  0x55   : > { %2537 = vmatpush.bf16.msra.mxu0 %v3895_v16 }
  0x58   : > { %2339 = vmatpush.bf16.msra.mxu3 %v3886_v40 }
  0x59   : > { %2538 = vmatpush.bf16.msra.mxu0 %v3894_v56 }
  0x5c   : > { %2340 = vmatpush.bf16.msra.mxu3 %v3885_v20 }
  0x5e   : > { %662 = vmatmul.bf16.gmra.mxu2 %v532_v29  ;;  %632 = vmatmul.bf16.gmra.mxu0 %v484_v30  ;;  %v1372_v29 = vor.u32 %v1371_v24, %v1367_v23  ;;  %v1376_v30 = vrot.slane %v1374_v25, 1  ;;  %v1396_v23 = vor.u32 %v1394_v15, %v1392_v61  ;;  %v840_v15 = vrot.slane %v4260_v10, 1  ;;  %v3829_v10 = vld [vmem:[%s4251_s10 + $0x44] sm:$0xff] }
  0x5f   : > { %791 = vmatmul.bf16.gmra.mxu3 %v4351_v59 }
  0x60   : > { %761 = vmatmul.bf16.gmra.mxu1 %v4360_v62  ;;  %v1377_v37 = vsel %vm448_vm0, %v1372_v29, %v1376_v30  ;;  %v1380_v45 = vor.u32 %v1378_v42, %v1376_v30  ;;  %v3826_v62 = vld [vmem:[%s4251_s10 + $0x2c] sm:$0xff]  ;;  %v3806_v29 = vld [vmem:[%s4251_s10 + $0x24] sm:$0xff]  ;;  %v837_v30 = vsel %vm828_vm1, %v834_v58, %v836_v22 }
  0x61   : > { %v1398_v17 = vshll.u32 %v3826_v62, 16  ;;  %v1647_v25 = vrot.slane %v3826_v62, 1 }
  0x62   : > { %v1385_v50 = vsel %vm448_vm0, %v1380_v45, %v1384_v46  ;;  %v1402_v45 = vshrl.u32 %v3826_v62, 16 }
  0x63   : > { %v1400_v24 = vrot.slane %v1398_v17, 1 }
  0x6e   : > { %667 = vmatmul.bf16.gmra.mxu2 %v540_v52  ;;  %637 = vmatmul.bf16.gmra.mxu0 %v492_v54  ;;  %v3867_v52 = vld [vmem:[%s5022_s1 + $0x1a8] sm:$0xff]  ;;  %v1386_v54 = vshrl.u32 %v3824_v41, 16 }
  0x6f   : > { %796 = vmatmul.bf16.gmra.mxu3 %v4376_v12  ;;  %1981 = vmatpush.bf16.msra.mxu2 %v3867_v52 }
  0x70   : > { %766 = vmatmul.bf16.gmra.mxu1 %v4389_v18  ;;  %v1388_v60 = vor.u32 %v1386_v54, %v1384_v46  ;;  %v3807_v54 = vld [vmem:[%s4251_s10 + $0x2c] sm:$0xff] }
  0x72   : > { %v1393_v4 = vsel %vm448_vm0, %v1388_v60, %v1392_v61 }
  0x73   : > { %1982 = vmatpush.bf16.msra.mxu2 %v3866_v21 }
  0x7e   : > { %672 = vmatmul.bf16.gmra.mxu2 %v548_v8  ;;  %642 = vmatmul.bf16.gmra.mxu0 %v500_v9 }
  0x7f   : > { %801 = vmatmul.bf16.gmra.mxu3 %v4406_v32 }
  0x80   : > { %771 = vmatmul.bf16.gmra.mxu1 %v4415_v35 }
  0x8e   : > { %922 = vmatmul.bf16.vlgmr.msrb.gmra.mxu2 %v831_v36  ;;  %1534 = vmatmul.bf16.vlgmr.msrb.gmra.mxu0 %v1377_v37  ;;  %v1648_v36 = vsel %vm828_vm1, %v1645_v63, %v1647_v25  ;;  %v3893_v37 = vld [vmem:[%s5022_s1 + $0x220] sm:$0xff] }
  0x8f   : > { %1176 = vmatmul.bf16.vlgmr.msrb.gmra.mxu3 %v3803_v34  ;;  %v1401_v34 = vsel %vm448_vm0, %v1396_v23, %v1400_v24  ;;  %2539 = vmatpush.bf16.msra.mxu0 %v3893_v37 }
  0x90   : > { %1733 = vmatmul.bf16.vlgmr.msrb.gmra.mxu1 %v1642_v38  ;;  %v3827_v38 = vld [vmem:[%s4251_s10 + $0x34] sm:$0xff] }
  0x91   : > { %v1406_v46 = vshll.u32 %v3827_v38, 16 }
  0x9e   : > { %927 = vmatmul.bf16.gmra.mxu2 %v833_v49  ;;  %1539 = vmatmul.bf16.gmra.mxu0 %v1385_v50  ;;  %v1404_v49 = vor.u32 %v1402_v45, %v1400_v24  ;;  %v1408_v50 = vrot.slane %v1406_v46, 1  ;;  %v3864_v45 = vld [vmem:[%s5022_s1 + $0x190] sm:$0xff] }
  0x9f   : > { %1181 = vmatmul.bf16.gmra.mxu3 %v3804_v48  ;;  %v838_v48 = vrot.slane %v4415_v35, 1  ;;  %v3865_v35 = vld [vmem:[%s5022_s1 + $0x198] sm:$0xff]  ;;  %v3883_v46 = vld [vmem:[%s5022_s1 + $0x1d0] sm:$0xff] }
  0xa0   : > { %1738 = vmatmul.bf16.gmra.mxu1 %v1644_v51  ;;  %v1649_v51 = vrot.slane %v3827_v38, 1  ;;  %v1409_v60 = vsel %vm448_vm0, %v1404_v49, %v1408_v50  ;;  %1983 = vmatpush.bf16.msra.mxu2 %v3865_v35 }
  0xa1   : > { %v839_v55 = vsel %vm828_vm1, %v836_v22, %v838_v48 }
  0xa2   : > { %v1650_v61 = vsel %vm828_vm1, %v1647_v25, %v1649_v51  ;;  %v3808_v25 = vld [vmem:[%s4251_s10 + $0x34] sm:$0xff] }
  0xa4   : > { %1984 = vmatpush.bf16.msra.mxu2 %v3864_v45 }
  0xab   : > { %v618_v2 = vpop.f32.mrf.mxu0 }
  0xad   : > { %v747_v3 = vpop.f32.mrf.mxu1 }
  0xae   : > { %v4510_v6 = vadd.f32 %v747_v3, %v618_v2  ;;  %932 = vmatmul.bf16.gmra.mxu2 %v835_v1  ;;  %1544 = vmatmul.bf16.gmra.mxu0 %v1393_v4  ;;  %v3828_v1 = vld [vmem:[%s4251_s10 + $0x3c] sm:$0xff] }
  0xaf   : > { %1186 = vmatmul.bf16.gmra.mxu3 %v3805_v0  ;;  %v3884_v0 = vld [vmem:[%s5022_s1 + $0x1d8] sm:$0xff]  ;;  %v1651_v20 = vrot.slane %v3828_v1, 1 }
  0xb0   : > { %1743 = vmatmul.bf16.gmra.mxu1 %v1646_v5  ;;  %2341 = vmatpush.bf16.msra.mxu3 %v3884_v0  ;;  %v3891_v0 = vld [vmem:[%s5022_s1 + $0x210] sm:$0xff] }
  0xb1   : > { %v648_v7 = vpop.f32.mrf.mxu2 }
  0xb2   : > { %v777_v8 = vpop.f32.mrf.mxu3 }
  0xb3   : > { %v4513_v9 = vadd.f32 %v777_v8, %v648_v7  ;;  %v620_v11 = vpop.f32.mrf.mxu0  ;;  %v1410_v7 = vshrl.u32 %v3827_v38, 16  ;;  %v1414_v8 = vshll.u32 %v3828_v1, 16 }
  0xb4   : > { %2342 = vmatpush.bf16.msra.mxu3 %v3883_v46 }
  0xb5   : > { %v749_v13 = vpop.f32.mrf.mxu1  ;;  %v1412_v17 = vor.u32 %v1410_v7, %v1408_v50  ;;  %v1416_v21 = vrot.slane %v1414_v8, 1  ;;  %v1426_v8 = vshrl.u32 %v3829_v10, 16 }
  0xb6   : > { %v4515_v19 = vadd.f32 %v749_v13, %v620_v11  ;;  %v3892_v13 = vld [vmem:[%s5022_s1 + $0x218] sm:$0xff] }
  0xb7   : > { %2540 = vmatpush.bf16.msra.mxu0 %v3892_v13 }
  0xb9   : > { %v650_v26 = vpop.f32.mrf.mxu2 }
  0xba   : > { %v779_v27 = vpop.f32.mrf.mxu3 }
  0xbb   : > { %v4524_v28 = vadd.f32 %v779_v27, %v650_v26  ;;  %v623_v31 = vpop.f32.mrf.mxu0  ;;  %v841_v26 = vsel %vm828_vm1, %v838_v48, %v840_v15  ;;  %v842_v48 = vrot.slane %v4270_v14, 1  ;;  %2541 = vmatpush.bf16.msra.mxu0 %v3891_v0 }
  0xbd   : > { %v752_v33 = vpop.f32.mrf.mxu1 }
  0xbe   : > { %v4530_v18 = vadd.f32 %v752_v33, %v623_v31  ;;  %937 = vmatmul.bf16.gmra.mxu2 %v837_v30  ;;  %1549 = vmatmul.bf16.gmra.mxu0 %v1401_v34  ;;  %v1417_v30 = vsel %vm448_vm0, %v1412_v17, %v1416_v21  ;;  %v1652_v31 = vsel %vm828_vm1, %v1649_v51, %v1651_v20  ;;  %v1653_v51 = vrot.slane %v3829_v10, 1 }
  0xbf   : > { %1191 = vmatmul.bf16.gmra.mxu3 %v3806_v29  ;;  %v844_v17 = vrot.slane %v4313_v39, 1  ;;  %v3863_v39 = vld [vmem:[%s5022_s1 + $0x188] sm:$0xff] }
  0xc0   : > { %1748 = vmatmul.bf16.gmra.mxu1 %v1648_v36  ;;  %v1654_v35 = vsel %vm828_vm1, %v1651_v20, %v1653_v51  ;;  %1985 = vmatpush.bf16.msra.mxu2 %v3863_v39 }
  0xc1   : > { %v653_v16 = vpop.f32.mrf.mxu2 }
  0xc2   : > { %v782_v41 = vpop.f32.mrf.mxu3 }
  0xc3   : > { %v4536_v42 = vadd.f32 %v782_v41, %v653_v16  ;;  %v625_v43 = vpop.f32.mrf.mxu0  ;;  %v1418_v41 = vshrl.u32 %v3828_v1, 16  ;;  %v3830_v1 = vld [vmem:[%s4251_s10 + $0x4c] sm:$0xff] }
  0xc4   : > { %v1430_v13 = vshll.u32 %v3830_v1, 16 }
  0xc5   : > { %v754_v44 = vpop.f32.mrf.mxu1  ;;  %v1420_v49 = vor.u32 %v1418_v41, %v1416_v21 }
  0xc6   : > { %v4538_v47 = vadd.f32 %v754_v44, %v625_v43  ;;  %v1422_v43 = vshll.u32 %v3829_v10, 16  ;;  %v1432_v20 = vrot.slane %v1430_v13, 1 }
  0xc8   : > { %v1424_v50 = vrot.slane %v1422_v43, 1 }
  0xc9   : > { %v655_v52 = vpop.f32.mrf.mxu2 }
  0xca   : > { %v784_v40 = vpop.f32.mrf.mxu3  ;;  %v1428_v21 = vor.u32 %v1426_v8, %v1424_v50 }
  0xcb   : > { %v4541_v53 = vadd.f32 %v784_v40, %v655_v52  ;;  %v628_v56 = vpop.f32.mrf.mxu0 }
  0xcc   : > { %v1433_v10 = vsel %vm448_vm0, %v1428_v21, %v1432_v20 }
  0xcd   : > { %v757_v58 = vpop.f32.mrf.mxu1 }
  0xce   : > { %v4547_v63 = vadd.f32 %v757_v58, %v628_v56  ;;  %942 = vmatmul.bf16.gmra.mxu2 %v839_v55  ;;  %1554 = vmatmul.bf16.gmra.mxu0 %v1409_v60  ;;  %v3809_v55 = vld [vmem:[%s4251_s10 + $0x3c] sm:$0xff]  ;;  %v843_v56 = vsel %vm828_vm1, %v840_v15, %v842_v48 }
  0xcf   : > { %1196 = vmatmul.bf16.gmra.mxu3 %v3807_v54 }
  0xd0   : > { %1753 = vmatmul.bf16.gmra.mxu1 %v1650_v61  ;;  %v1425_v61 = vsel %vm448_vm0, %v1420_v49, %v1424_v50  ;;  %v1434_v49 = vshrl.u32 %v3830_v1, 16 }
  0xd1   : > { %v658_v2 = vpop.f32.mrf.mxu2 }
  0xd2   : > { %v787_v3 = vpop.f32.mrf.mxu3 }
  0xd3   : > { %v4556_v4 = vadd.f32 %v787_v3, %v658_v2  ;;  %v630_v5 = vpop.f32.mrf.mxu0 }
  0xd5   : > { %v759_v62 = vpop.f32.mrf.mxu1 }
  0xd6   : > { %v4558_v11 = vadd.f32 %v759_v62, %v630_v5 }
  0xd9   : > { %v660_v22 = vpop.f32.mrf.mxu2 }
  0xda   : > { %v789_v23 = vpop.f32.mrf.mxu3 }
  0xdb   : > { %v4564_v24 = vadd.f32 %v789_v23, %v660_v22  ;;  %v633_v27 = vpop.f32.mrf.mxu0  ;;  %v1655_v22 = vrot.slane %v3830_v1, 1  ;;  %v3811_v1 = vld [vmem:[%s4251_s10 + $0x4c] sm:$0xff] }
  0xdd   : > { %v762_v29 = vpop.f32.mrf.mxu1 }
  0xde   : > { %v4570_v33 = vadd.f32 %v762_v29, %v633_v27  ;;  %947 = vmatmul.bf16.gmra.mxu2 %v841_v26  ;;  %1559 = vmatmul.bf16.gmra.mxu0 %v1417_v30  ;;  %v3810_v27 = vld [vmem:[%s4251_s10 + $0x44] sm:$0xff]  ;;  %v845_v29 = vsel %vm828_vm1, %v842_v48, %v844_v17 }
  0xdf   : > { %1201 = vmatmul.bf16.gmra.mxu3 %v3808_v25 }
  0xe0   : > { %1758 = vmatmul.bf16.gmra.mxu1 %v1652_v31 }
  0xe1   : > { %v663_v34 = vpop.f32.mrf.mxu2 }
  0xe2   : > { %v792_v36 = vpop.f32.mrf.mxu3 }
  0xe3   : > { %v4573_v37 = vadd.f32 %v792_v36, %v663_v34  ;;  %v635_v38 = vpop.f32.mrf.mxu0  ;;  %v1656_v34 = vsel %vm828_vm1, %v1653_v51, %v1655_v22  ;;  %v3904_v51 = vld [vmem:[%s5024_s3 + $0x38] sm:$0xff] }
  0xe4   : > { %2761 = vmatpush.bf16.msra.mxu1 %v3904_v51  ;;  %v3889_v51 = vld [vmem:[%s5022_s1 + $0x200] sm:$0xff] }
  0xe5   : > { %v764_v16 = vpop.f32.mrf.mxu1 }
  0xe6   : > { %v4575_v44 = vadd.f32 %v764_v16, %v635_v38  ;;  %v3831_v38 = vld [vmem:[%s4251_s10 + $0x54] sm:$0xff]  ;;  %v3882_v16 = vld [vmem:[%s5022_s1 + $0x1c8] sm:$0xff] }
  0xe7   : > { %2343 = vmatpush.bf16.msra.mxu3 %v3882_v16  ;;  %v1438_v50 = vshll.u32 %v3831_v38, 16  ;;  %v3812_v16 = vld [vmem:[%s4251_s10 + $0x54] sm:$0xff] }
  0xe9   : > { %v665_v52 = vpop.f32.mrf.mxu2 }
  0xea   : > { %v794_v40 = vpop.f32.mrf.mxu3 }
  0xeb   : > { %v4584_v54 = vadd.f32 %v794_v40, %v665_v52  ;;  %v638_v58 = vpop.f32.mrf.mxu0  ;;  %v846_v40 = vrot.slane %v4351_v59, 1 }
  0xed   : > { %v767_v60 = vpop.f32.mrf.mxu1 }
  0xee   : > { %v4590_v14 = vadd.f32 %v767_v60, %v638_v58  ;;  %952 = vmatmul.bf16.gmra.mxu2 %v843_v56  ;;  %1564 = vmatmul.bf16.gmra.mxu0 %v1425_v61  ;;  %v1440_v56 = vrot.slane %v1438_v50, 1  ;;  %v1657_v58 = vrot.slane %v3831_v38, 1  ;;  %v3890_v60 = vld [vmem:[%s5022_s1 + $0x208] sm:$0xff]  ;;  %v3903_v50 = vld [vmem:[%s5024_s3 + $0x30] sm:$0xff] }
  0xef   : > { %1206 = vmatmul.bf16.gmra.mxu3 %v3809_v55  ;;  %v1436_v55 = vor.u32 %v1434_v49, %v1432_v20  ;;  %2542 = vmatpush.bf16.msra.mxu0 %v3890_v60 }
  0xf0   : > { %1763 = vmatmul.bf16.gmra.mxu1 %v1654_v35  ;;  %v1658_v59 = vsel %vm828_vm1, %v1655_v22, %v1657_v58  ;;  %v848_v22 = vrot.slane %v4376_v12, 1 }
  0xf1   : > { %v668_v2 = vpop.f32.mrf.mxu2  ;;  %2762 = vmatpush.bf16.msra.mxu1 %v3903_v50 }
  0xf2   : > { %v797_v3 = vpop.f32.mrf.mxu3 }
  0xf3   : > { %v4596_v5 = vadd.f32 %v797_v3, %v668_v2  ;;  %v640_v62 = vpop.f32.mrf.mxu0  ;;  %v847_v2 = vsel %vm828_vm1, %v844_v17, %v846_v40  ;;  %v3862_v17 = vld [vmem:[%s5022_s1 + $0x180] sm:$0xff]  ;;  %2543 = vmatpush.bf16.msra.mxu0 %v3889_v51 }
  0xf4   : > { %1986 = vmatpush.bf16.msra.mxu2 %v3862_v17 }
  0xf5   : > { %v769_v7 = vpop.f32.mrf.mxu1 }
  0xf6   : > { %v4598_v15 = vadd.f32 %v769_v7, %v640_v62  ;;  %v1441_v62 = vsel %vm448_vm0, %v1436_v55, %v1440_v56  ;;  %v3832_v7 = vld [vmem:[%s4251_s10 + $0x5c] sm:$0xff] }
  0xf9   : > { %v670_v23 = vpop.f32.mrf.mxu2 }
  0xfa   : > { %v799_v25 = vpop.f32.mrf.mxu3 }
  0xfb   : > { %v4601_v26 = vadd.f32 %v799_v25, %v670_v23  ;;  %v643_v30 = vpop.f32.mrf.mxu0  ;;  %v1442_v25 = vshrl.u32 %v3831_v38, 16 }
  0xfd   : > { %v772_v31 = vpop.f32.mrf.mxu1 }
  0xfe   : > { %v4607_v36 = vadd.f32 %v772_v31, %v643_v30  ;;  %957 = vmatmul.bf16.gmra.mxu2 %v845_v29  ;;  %1569 = vmatmul.bf16.gmra.mxu0 %v1433_v10  ;;  %v1444_v30 = vor.u32 %v1442_v25, %v1440_v56  ;;  %v1659_v10 = vrot.slane %v3832_v7, 1 }
  0xff   : > { %1211 = vmatmul.bf16.gmra.mxu3 %v3810_v27  ;;  %v1446_v27 = vshll.u32 %v3832_v7, 16 }
 0x100   : > { %1768 = vmatmul.bf16.gmra.mxu1 %v1656_v34 }
 0x101   : > { %v673_v41 = vpop.f32.mrf.mxu2  ;;  %v1448_v31 = vrot.slane %v1446_v27, 1 }
 0x102   : > { %v802_v43 = vpop.f32.mrf.mxu3 }
 0x103   : > { %v4616_v45 = vadd.f32 %v802_v43, %v673_v41  ;;  %v645_v46 = vpop.f32.mrf.mxu0  ;;  %v849_v41 = vsel %vm828_vm1, %v846_v40, %v848_v22  ;;  %v1449_v12 = vsel %vm448_vm0, %v1444_v30, %v1448_v31 }
 0x105   : > { %v774_v48 = vpop.f32.mrf.mxu1 }
 0x106   : > { %v4621_v52 = vadd.f32 %v774_v48, %v645_v46  ;;  %v1660_v48 = vsel %vm828_vm1, %v1657_v58, %v1659_v10 }
 0x109   : > { %v675_v61 = vpop.f32.mrf.mxu2 }
 0x10a   : > { %v804_v35 = vpop.f32.mrf.mxu3 }
 0x10b   : > { %v4627_v0 = vadd.f32 %v804_v35, %v675_v61  ;;  %v1535_v3 = vpop.f32.mrf.mxu0  ;;  %v1450_v61 = vshrl.u32 %v3832_v7, 16 }
 0x10e   : > { %962 = vmatmul.bf16.gmra.mxu2 %v847_v2  ;;  %1574 = vmatmul.bf16.gmra.mxu0 %v1441_v62  ;;  %v850_v2 = vrot.slane %v4406_v32, 1 }
 0x10f   : > { %1216 = vmatmul.bf16.gmra.mxu3 %v3811_v1 }
 0x110   : > { %1773 = vmatmul.bf16.gmra.mxu1 %v1658_v59 }
 0x111   : > { %v923_v8 = vpop.f32.mrf.mxu2 }
 0x112   : > { %v1177_v13 = vpop.f32.mrf.mxu3  ;;  %v983_v21 = vadd.f32 %v923_v8, %v4510_v6  ;;  %v3881_v6 = vld [vmem:[%s5022_s1 + $0x1c0] sm:$0xff] }
 0x113   : > { %v1537_v23 = vpop.f32.mrf.mxu0  ;;  %2344 = vmatpush.bf16.msra.mxu3 %v3881_v6 }
 0x114   : > { %v1237_v20 = vadd.f32 %v1177_v13, %v983_v21  ;;  %v1285_v21 = vld [vmem:[%s4251_s10 + $0x6c] sm:$0x1] }
 0x115   : > { %v1352_v30 = vunpack.c.l.b16 %v1285_v21 }
 0x116   : > { %v4638_v29 = vadd.f32 %v1535_v3, %v1237_v20  ;;  %v1452_v3 = vor.u32 %v1450_v61, %v1448_v31 }
 0x117   : > { %v1365_v31 = vpack.c.b16 %v1352_v30, %v1352_v30 }
 0x119   : > { %v925_v34 = vpop.f32.mrf.mxu2 }
 0x11a   : > { %v1179_v39 = vpop.f32.mrf.mxu3  ;;  %v984_v38 = vadd.f32 %v925_v34, %v4515_v19  ;;  %v3833_v19 = vld [vmem:[%s4251_s10 + $0x64] sm:$0xff] }
 0x11b   : > { %v1540_v46 = vpop.f32.mrf.mxu0  ;;  %v1454_v35 = vshll.u32 %v3833_v19, 16  ;;  %v1661_v59 = vrot.slane %v3833_v19, 1 }
 0x11c   : > { %v1238_v43 = vadd.f32 %v1179_v39, %v984_v38  ;;  %v1458_v38 = vshrl.u32 %v3833_v19, 16  ;;  %v3814_v19 = vld [vmem:[%s4251_s10 + $0x64] sm:$0xff] }
 0x11d   : > { %v1456_v62 = vrot.slane %v1454_v35, 1  ;;  %v1662_v17 = vsel %vm828_vm1, %v1659_v10, %v1661_v59  ;;  %v3902_v10 = vld [vmem:[%s5024_s3 + $0x28] sm:$0xff]  ;;  %v3870_v35 = vld [vmem:[%s4251_s10 + $0x20] sm:$0xff] }
 0x11e   : > { %967 = vmatmul.bf16.gmra.mxu2 %v849_v41  ;;  %v4649_v49 = vadd.f32 %v1537_v23, %v1238_v43  ;;  %1579 = vmatmul.bf16.gmra.mxu0 %v1449_v12  ;;  %v3813_v23 = vld [vmem:[%s4251_s10 + $0x5c] sm:$0xff]  ;;  %v852_v43 = vrot.slane %v4447_v57, 1 }
 0x11f   : > { %1221 = vmatmul.bf16.gmra.mxu3 %v3812_v16  ;;  %v1457_v7 = vsel %vm448_vm0, %v1452_v3, %v1456_v62  ;;  %v1462_v16 = vshll.u32 %v1365_v31, 16  ;;  %2763 = vmatpush.bf16.msra.mxu1 %v3902_v10  ;;  %v4024_v57 = vld [vmem:[%s4251_s10 + $0x18] sm:$0xff]  }
 0x120   : > { %1778 = vmatmul.bf16.gmra.mxu1 %v1660_v48  ;;  %v1663_v48 = vrot.slane %v1365_v31, 1  ;;  %v2178_v21 = vshrl.u32 %v4024_v57, 16  ;;  %v2452_v31 = vrot.slane %v3870_v35, 1 }
 0x121   : > { %v928_v40 = vpop.f32.mrf.mxu2  ;;  %v1464_v12 = vrot.slane %v1462_v16, 1 }
 0x122   : > { %v1182_v55 = vpop.f32.mrf.mxu3  ;;  %v985_v56 = vadd.f32 %v928_v40, %v4530_v18  ;;  %v851_v18 = vsel %vm828_vm1, %v848_v22, %v850_v2  ;;  %v853_v40 = vsel %vm828_vm1, %v850_v2, %v852_v43  ;;  %v4026_v2 = vld [vmem:[%s4251_s10 + $0x18] sm:$0xe]  ;;  %v3901_v43 = vld [vmem:[%s5024_s3 + $0x20] sm:$0xff] }
 0x123   : > { %v1542_v60 = vpop.f32.mrf.mxu0  ;;  %2764 = vmatpush.bf16.msra.mxu1 %v3901_v43 }
 0x124   : > { %v1239_v58 = vadd.f32 %v1182_v55, %v985_v56 }
 0x126   : > { %v4659_v1 = vadd.f32 %v1540_v46, %v1239_v58  ;;  %v1460_v46 = vor.u32 %v1458_v38, %v1456_v62 }
 0x128   : > { %v1465_v58 = vsel %vm448_vm0, %v1460_v46, %v1464_v12  ;;  %v3871_v46 = vld [vmem:[%s4251_s10 + $0x28] sm:$0xff] }
 0x129   : > { %v930_v8 = vpop.f32.mrf.mxu2 }
 0x12a   : > { %v1184_v13 = vpop.f32.mrf.mxu3  ;;  %v986_v20 = vadd.f32 %v930_v8, %v4538_v47  ;;  %v4025_v8 = vld [vmem:[%s4251_s10 + $0x18] sm:$0xf0] }
 0x12b   : > { %v1545_v27 = vpop.f32.mrf.mxu0 }
 0x12c   : > { %v1240_v25 = vadd.f32 %v1184_v13, %v986_v20 }
 0x12e   : > { %972 = vmatmul.bf16.gmra.mxu2 %v851_v18  ;;  %v4668_v32 = vadd.f32 %v1542_v60, %v1240_v25  ;;  %1584 = vmatmul.bf16.gmra.mxu0 %v1457_v7  ;;  %v1664_v60 = vsel %vm828_vm1, %v1661_v59, %v1663_v48  ;;  %v4027_v25 = vor.u32 %v4026_v2, %v4025_v8 }
 0x12f   : > { %1226 = vmatmul.bf16.gmra.mxu3 %v3813_v23  ;;  %v2185_v23 = vshll.u32 %v3870_v35, 16 }
 0x130   : > { %1783 = vmatmul.bf16.gmra.mxu1 %v1662_v17  ;;  %v2451_v30 = vrot.slane %v4027_v25, 1 }
 0x131   : > { %v933_v6 = vpop.f32.mrf.mxu2  ;;  %v2187_v17 = vrot.slane %v2185_v23, 1 }
 0x132   : > { %v1187_v34 = vpop.f32.mrf.mxu3  ;;  %v987_v47 = vadd.f32 %v933_v6, %v4547_v63  ;;  %v2453_v16 = vsel %vm828_vm1, %v2451_v30, %v2452_v31 }
 0x133   : > { %v1547_v39 = vpop.f32.mrf.mxu0 }
 0x134   : > { %v1241_v22 = vadd.f32 %v1187_v34, %v987_v47 }
 0x136   : > { %v4674_v41 = vadd.f32 %v1545_v27, %v1241_v22  ;;  %v3850_v22 = vld [vmem:[%s4251_s10 + $0x18] sm:$0xff] }
 0x139   : > { %v935_v50 = vpop.f32.mrf.mxu2 }
 0x13a   : > { %v1189_v63 = vpop.f32.mrf.mxu3  ;;  %v988_v51 = vadd.f32 %v935_v50, %v4558_v11  ;;  %v2180_v11 = vshll.u32 %v4024_v57, 16  ;;  %v2189_v50 = vshrl.u32 %v3870_v35, 16 }
 0x13b   : > { %v1550_v56 = vpop.f32.mrf.mxu0 }
 0x13c   : > { %v1242_v55 = vadd.f32 %v1189_v63, %v988_v51  ;;  %v2182_v20 = vrot.slane %v2180_v11, 1  ;;  %v2193_v63 = vshll.u32 %v3871_v46, 16 }
 0x13e   : > { %977 = vmatmul.bf16.gmra.mxu2 %v853_v40  ;;  %v4683_v61 = vadd.f32 %v1547_v39, %v1242_v55  ;;  %1589 = vmatmul.bf16.gmra.mxu0 %v1465_v58  ;;  %v2183_v7 = vor.u32 %v2182_v20, %v2178_v21  ;;  %v2191_v55 = vor.u32 %v2189_v50, %v2187_v17  ;;  %v2454_v58 = vrot.slane %v3871_v46, 1 }
 0x13f   : > { %1231 = vmatmul.bf16.gmra.mxu3 %v3814_v19 }
 0x140   : > { %1788 = vmatmul.bf16.gmra.mxu1 %v1664_v60 }
 0x141   : > { %v938_v3 = vpop.f32.mrf.mxu2 }
 0x142   : > { %v1192_v62 = vpop.f32.mrf.mxu3  ;;  %v989_v13 = vadd.f32 %v938_v3, %v4570_v33  ;;  %v2188_v33 = vsel %vm448_vm0, %v2183_v7, %v2187_v17  ;;  %v3851_v3 = vld [vmem:[%s4251_s10 + $0x20] sm:$0xff]  ;;  %v3900_v7 = vld [vmem:[%s5024_s3 + $0x18] sm:$0xff] }
 0x143   : > { %v1552_v18 = vpop.f32.mrf.mxu0  ;;  %2765 = vmatpush.bf16.msra.mxu1 %v3900_v7 }
 0x144   : > { %v1243_v59 = vadd.f32 %v1192_v62, %v989_v13  ;;  %v3872_v13 = vld [vmem:[%s4251_s10 + $0x30] sm:$0xff] }
 0x145   : > { %v2205_v50 = vshrl.u32 %v3872_v13, 16 }
 0x146   : > { %v4689_v27 = vadd.f32 %v1550_v56, %v1243_v59  ;;  %v2195_v56 = vrot.slane %v2193_v63, 1  ;;  %v2197_v59 = vshrl.u32 %v3871_v46, 16  ;;  %v3873_v46 = vld [vmem:[%s4251_s10 + $0x38] sm:$0xff]  ;;  %v4725_v63 = vpop.f32.mrf.mxu1 }
 0x148   : > { %v2196_v62 = vsel %vm448_vm0, %v2191_v55, %v2195_v56  ;;  %v2199_v30 = vor.u32 %v2197_v59, %v2195_v56 }
 0x149   : > { %v940_v6 = vpop.f32.mrf.mxu2 }
 0x14a   : > { %v1194_v34 = vpop.f32.mrf.mxu3  ;;  %v990_v47 = vadd.f32 %v940_v6, %v4575_v44  ;;  %v2456_v6 = vrot.slane %v3872_v13, 1 }
 0x14b   : > { %v1555_v38 = vpop.f32.mrf.mxu0 }
 0x14c   : > { %v1244_v39 = vadd.f32 %v1194_v34, %v990_v47 }
 0x14e   : > { %1987 = vmatmul.bf16.vlgmr.msra.gmra.mxu2 %v3850_v22  ;;  %v4695_v10 = vadd.f32 %v1552_v18, %v1244_v39  ;;  %2544 = vmatmul.bf16.vlgmr.msra.gmra.mxu0 %v2453_v16  ;;  %v2457_v16 = vsel %vm828_vm1, %v2454_v58, %v2456_v6 }
 0x14f   : > { %2345 = vmatmul.bf16.vlgmr.msra.gmra.mxu3 %v2188_v33 }
 0x151   : > { %v943_v44 = vpop.f32.mrf.mxu2 }
 0x152   : > { %v1197_v12 = vpop.f32.mrf.mxu3  ;;  %v991_v48 = vadd.f32 %v943_v44, %v4590_v14  ;;  %v2455_v14 = vsel %vm828_vm1, %v2452_v31, %v2454_v58 }
 0x153   : > { %v1557_v19 = vpop.f32.mrf.mxu0 }
 0x154   : > { %v1245_v51 = vadd.f32 %v1197_v12, %v991_v48 }
 0x156   : > { %v4702_v40 = vadd.f32 %v1555_v38, %v1245_v51 }
 0x159   : > { %v945_v60 = vpop.f32.mrf.mxu2 }
 0x15a   : > { %v1199_v57 = vpop.f32.mrf.mxu3  ;;  %v992_v11 = vadd.f32 %v945_v60, %v4598_v15  ;;  %v2201_v15 = vshll.u32 %v3872_v13, 16  ;;  %v2458_v60 = vrot.slane %v3873_v46, 1  ;;  %v4733_v13 = vpop.f32.mrf.mxu1 }
 0x15b   : > { %v1560_v2 = vpop.f32.mrf.mxu0 }
 0x15c   : > { %v1246_v8 = vadd.f32 %v1199_v57, %v992_v11  ;;  %v2203_v31 = vrot.slane %v2201_v15, 1 }
 0x15e   : > { %1992 = vmatmul.bf16.gmra.mxu2 %v3851_v3  ;;  %v4708_v35 = vadd.f32 %v1557_v19, %v1246_v8  ;;  %2549 = vmatmul.bf16.gmra.mxu0 %v2455_v14  ;;  %v2204_v33 = vsel %vm448_vm0, %v2199_v30, %v2203_v31  ;;  %v2207_v56 = vor.u32 %v2205_v50, %v2203_v31 }
 0x15f   : > { %2350 = vmatmul.bf16.gmra.mxu3 %v2196_v62  ;;  %v3853_v62 = vld [vmem:[%s4251_s10 + $0x30] sm:$0xff]  ;;  %v2459_v14 = vsel %vm828_vm1, %v2456_v6, %v2458_v60 }
 0x161   : > { %v948_v21 = vpop.f32.mrf.mxu2 }
 0x162   : > { %v1202_v20 = vpop.f32.mrf.mxu3  ;;  %v993_v23 = vadd.f32 %v948_v21, %v4607_v36  ;;  %v3852_v36 = vld [vmem:[%s4251_s10 + $0x28] sm:$0xff] }
 0x163   : > { %v1562_v25 = vpop.f32.mrf.mxu0 }
 0x164   : > { %v1247_v18 = vadd.f32 %v1202_v20, %v993_v23  ;;  %v3899_v20 = vld [vmem:[%s5024_s3 + $0x10] sm:$0xff]  ;;  %v3874_v23 = vld [vmem:[%s4251_s10 + $0x40] sm:$0xff] }
 0x165   : > { %2766 = vmatpush.bf16.msra.mxu1 %v3899_v20 }
 0x166   : > { %v4715_v17 = vadd.f32 %v1560_v2, %v1247_v18  ;;  %v2213_v18 = vshrl.u32 %v3873_v46, 16 }
 0x169   : > { %v950_v34 = vpop.f32.mrf.mxu2 }
 0x16a   : > { %v1204_v47 = vpop.f32.mrf.mxu3  ;;  %v994_v22 = vadd.f32 %v950_v34, %v4621_v52  ;;  %v2209_v52 = vshll.u32 %v3873_v46, 16 }
 0x16b   : > { %v1565_v38 = vpop.f32.mrf.mxu0 }
 0x16c   : > { %v1248_v39 = vadd.f32 %v1204_v47, %v994_v22  ;;  %v2211_v58 = vrot.slane %v2209_v52, 1  ;;  %v4744_v47 = vpop.f32.mrf.mxu1  ;;  %v2460_v22 = vrot.slane %v3874_v23, 1 }
 0x16e   : > { %1997 = vmatmul.bf16.gmra.mxu2 %v3852_v36  ;;  %v4721_v43 = vadd.f32 %v1562_v25, %v1248_v39  ;;  %2554 = vmatmul.bf16.gmra.mxu0 %v2457_v16  ;;  %v2212_v8 = vsel %vm448_vm0, %v2207_v56, %v2211_v58  ;;  %v2217_v25 = vshll.u32 %v3874_v23, 16  ;;  %v2215_v6 = vor.u32 %v2213_v18, %v2211_v58 }
 0x16f   : > { %2355 = vmatmul.bf16.gmra.mxu3 %v2204_v33 }
 0x170   : > { %v2219_v34 = vrot.slane %v2217_v25, 1  ;;  %v3876_v25 = vld [vmem:[%s4251_s10 + $0x50] sm:$0xff] }
 0x171   : > { %v953_v44 = vpop.f32.mrf.mxu2 }
 0x172   : > { %v1207_v12 = vpop.f32.mrf.mxu3  ;;  %v995_v48 = vadd.f32 %v953_v44, %v4513_v9  ;;  %v2220_v16 = vsel %vm448_vm0, %v2215_v6, %v2219_v34  ;;  %v2461_v44 = vsel %vm828_vm1, %v2458_v60, %v2460_v22  ;;  %v3898_v60 = vld [vmem:[%s5024_s3 + $0x8] sm:$0xff] }
 0x173   : > { %v1567_v19 = vpop.f32.mrf.mxu0  ;;  %2767 = vmatpush.bf16.msra.mxu1 %v3898_v60 }
 0x174   : > { %v1249_v51 = vadd.f32 %v1207_v12, %v995_v48  ;;  %v3875_v48 = vld [vmem:[%s4251_s10 + $0x48] sm:$0xff] }
 0x175   : > { %v2225_v56 = vshll.u32 %v3875_v48, 16  ;;  %v2229_v6 = vshrl.u32 %v3875_v48, 16 }
 0x176   : > { %v4727_v55 = vadd.f32 %v1565_v38, %v1249_v51  ;;  %v3854_v38 = vld [vmem:[%s4251_s10 + $0x38] sm:$0xff]  ;;  %v4753_v51 = vpop.f32.mrf.mxu1 }
 0x179   : > { %v955_v57 = vpop.f32.mrf.mxu2 }
 0x17a   : > { %v1209_v11 = vpop.f32.mrf.mxu3  ;;  %v996_v3 = vadd.f32 %v955_v57, %v4524_v28 }
 0x17b   : > { %v1570_v2 = vpop.f32.mrf.mxu0 }
 0x17c   : > { %v1250_v9 = vadd.f32 %v1209_v11, %v996_v3 }
 0x17e   : > { %2002 = vmatmul.bf16.gmra.mxu2 %v3853_v62  ;;  %v4735_v21 = vadd.f32 %v1567_v19, %v1250_v9  ;;  %2559 = vmatmul.bf16.gmra.mxu0 %v2459_v14  ;;  %v2221_v19 = vshrl.u32 %v3874_v23, 16  ;;  %v2227_v62 = vrot.slane %v2225_v56, 1  ;;  %v4764_v23 = vpop.f32.mrf.mxu1 }
 0x17f   : > { %2360 = vmatmul.bf16.gmra.mxu3 %v2212_v8  ;;  %v2462_v8 = vrot.slane %v3875_v48, 1 }
 0x180   : > { %v2223_v3 = vor.u32 %v2221_v19, %v2219_v34  ;;  %v2233_v34 = vshll.u32 %v3876_v25, 16 }
 0x181   : > { %v958_v28 = vpop.f32.mrf.mxu2 }
 0x182   : > { %v1212_v59 = vpop.f32.mrf.mxu3  ;;  %v997_v15 = vadd.f32 %v958_v28, %v4536_v42  ;;  %v2228_v20 = vsel %vm448_vm0, %v2223_v3, %v2227_v62 }
 0x183   : > { %v1572_v30 = vpop.f32.mrf.mxu0 }
 0x184   : > { %v1251_v7 = vadd.f32 %v1212_v59, %v997_v15  ;;  %v2463_v15 = vsel %vm828_vm1, %v2460_v22, %v2462_v8  ;;  %v2231_v22 = vor.u32 %v2229_v6, %v2227_v62  ;;  %v3857_v6 = vld [vmem:[%s4251_s10 + $0x50] sm:$0xff] }
 0x186   : > { %v4742_v31 = vadd.f32 %v1570_v2, %v1251_v7 }
 0x189   : > { %v960_v36 = vpop.f32.mrf.mxu2 }
 0x18a   : > { %v1214_v33 = vpop.f32.mrf.mxu3  ;;  %v998_v39 = vadd.f32 %v960_v36, %v4541_v53 }
 0x18b   : > { %v1575_v46 = vpop.f32.mrf.mxu0 }
 0x18c   : > { %v1252_v42 = vadd.f32 %v1214_v33, %v998_v39  ;;  %v4771_v39 = vpop.f32.mrf.mxu1 }
 0x18e   : > { %2007 = vmatmul.bf16.gmra.mxu2 %v3854_v38  ;;  %v4750_v12 = vadd.f32 %v1572_v30, %v1252_v42  ;;  %2564 = vmatmul.bf16.gmra.mxu0 %v2461_v44  ;;  %v2464_v42 = vrot.slane %v3876_v25, 1 }
 0x18f   : > { %2365 = vmatmul.bf16.gmra.mxu3 %v2220_v16  ;;  %v2235_v16 = vrot.slane %v2233_v34, 1 }
 0x190   : > { %v2465_v19 = vsel %vm828_vm1, %v2462_v8, %v2464_v42 }
 0x191   : > { %v963_v50 = vpop.f32.mrf.mxu2 }
 0x192   : > { %v1217_v52 = vpop.f32.mrf.mxu3  ;;  %v999_v53 = vadd.f32 %v963_v50, %v4556_v4  ;;  %v3855_v4 = vld [vmem:[%s4251_s10 + $0x40] sm:$0xff] }
 0x193   : > { %v1577_v57 = vpop.f32.mrf.mxu0 }
 0x194   : > { %v1253_v58 = vadd.f32 %v1217_v52, %v999_v53  ;;  %v3856_v52 = vld [vmem:[%s4251_s10 + $0x48] sm:$0xff]  ;;  %v2236_v53 = vsel %vm448_vm0, %v2231_v22, %v2235_v16  ;;  %v4785_v60 = vpop.f32.mrf.mxu1  ;;  %v3878_v22 = vld [vmem:[%s4251_s10 + $0x60] sm:$0xff] }
 0x196   : > { %v4759_v11 = vadd.f32 %v1575_v46, %v1253_v58  ;;  %v3897_v58 = vld [vmem:[%s5024_s3] sm:$0xff] }
 0x197   : > { %2768 = vmatpush.bf16.msra.mxu1 %v3897_v58  ;;  %v2468_v58 = vrot.slane %v3878_v22, 1 }
 0x199   : > { %v965_v9 = vpop.f32.mrf.mxu2 }
 0x19a   : > { %v1219_v2 = vpop.f32.mrf.mxu3  ;;  %v1000_v14 = vadd.f32 %v965_v9, %v4564_v24  ;;  %v2237_v9 = vshrl.u32 %v3876_v25, 16 }
 0x19b   : > { %v1580_v59 = vpop.f32.mrf.mxu0 }
 0x19c   : > { %v1254_v28 = vadd.f32 %v1219_v2, %v1000_v14 }
 0x19e   : > { %2012 = vmatmul.bf16.gmra.mxu2 %v3855_v4  ;;  %v4767_v18 = vadd.f32 %v1577_v57, %v1254_v28  ;;  %2569 = vmatmul.bf16.gmra.mxu0 %v2463_v15  ;;  %v3877_v57 = vld [vmem:[%s4251_s10 + $0x58] sm:$0xff] }
 0x19f   : > { %2370 = vmatmul.bf16.gmra.mxu3 %v2228_v20  ;;  %v2241_v8 = vshll.u32 %v3877_v57, 16  ;;  %v2239_v20 = vor.u32 %v2237_v9, %v2235_v16  ;;  %v3858_v9 = vld [vmem:[%s4251_s10 + $0x58] sm:$0xff] }
 0x1a1   : > { %v968_v7 = vpop.f32.mrf.mxu2  ;;  %v2243_v28 = vrot.slane %v2241_v8, 1 }
 0x1a2   : > { %v1222_v30 = vpop.f32.mrf.mxu3  ;;  %v1001_v24 = vadd.f32 %v968_v7, %v4573_v37 }
 0x1a3   : > { %v1582_v33 = vpop.f32.mrf.mxu0  ;;  %v2244_v34 = vsel %vm448_vm0, %v2239_v20, %v2243_v28 }
 0x1a4   : > { %v1255_v36 = vadd.f32 %v1222_v30, %v1001_v24  ;;  %v4790_v30 = vpop.f32.mrf.mxu1 }
 0x1a6   : > { %v4773_v38 = vadd.f32 %v1580_v59, %v1255_v36  ;;  %v2466_v59 = vrot.slane %v3877_v57, 1 }
 0x1a8   : > { %v2467_v36 = vsel %vm828_vm1, %v2464_v42, %v2466_v59 }
 0x1a9   : > { %v970_v46 = vpop.f32.mrf.mxu2 }
 0x1aa   : > { %v1224_v44 = vpop.f32.mrf.mxu3  ;;  %v1002_v50 = vadd.f32 %v970_v46, %v4584_v54 }
 0x1ab   : > { %v1585_v48 = vpop.f32.mrf.mxu0 }
 0x1ac   : > { %v1256_v37 = vadd.f32 %v1224_v44, %v1002_v50  ;;  %v2245_v50 = vshrl.u32 %v3877_v57, 16 }
 0x1ae   : > { %2017 = vmatmul.bf16.gmra.mxu2 %v3856_v52  ;;  %v4779_v56 = vadd.f32 %v1582_v33, %v1256_v37  ;;  %2574 = vmatmul.bf16.gmra.mxu0 %v2465_v19  ;;  %v4800_v52 = vpop.f32.mrf.mxu1  ;;  %v2247_v42 = vor.u32 %v2245_v50, %v2243_v28  ;;  %v3879_v28 = vld [vmem:[%s4251_s10 + $0x68] sm:$0xff] }
 0x1af   : > { %2375 = vmatmul.bf16.gmra.mxu3 %v2236_v53 }
 0x1b1   : > { %v973_v54 = vpop.f32.mrf.mxu2 }
 0x1b2   : > { %v1227_v3 = vpop.f32.mrf.mxu3  ;;  %v1003_v62 = vadd.f32 %v973_v54, %v4596_v5 }
 0x1b3   : > { %v1587_v14 = vpop.f32.mrf.mxu0 }
 0x1b4   : > { %v1257_v2 = vadd.f32 %v1227_v3, %v1003_v62 }
 0x1b6   : > { %v4788_v4 = vadd.f32 %v1585_v48, %v1257_v2  ;;  %v2469_v2 = vsel %vm828_vm1, %v2466_v59, %v2468_v58 }
 0x1b9   : > { %v975_v15 = vpop.f32.mrf.mxu2 }
 0x1ba   : > { %v1229_v7 = vpop.f32.mrf.mxu3  ;;  %v1004_v24 = vadd.f32 %v975_v15, %v4601_v26  ;;  %v2249_v26 = vshll.u32 %v3878_v22, 16  ;;  %v1794_v15 = vadd.f32 %v4725_v63, %v4638_v29  ;;  %v4822_v63 = vld [vmem:[%s5023_s2] ss:$0 sm:$0xff] }
 0x1bb   : > { %v1590_v25 = vpop.f32.mrf.mxu0 }
 0x1bc   : > { %v1258_v5 = vadd.f32 %v1229_v7, %v1004_v24  ;;  %v2251_v19 = vrot.slane %v2249_v26, 1 }
 0x1be   : > { %2022 = vmatmul.bf16.gmra.mxu2 %v3857_v6  ;;  %v4796_v33 = vadd.f32 %v1587_v14, %v1258_v5  ;;  %2579 = vmatmul.bf16.gmra.mxu0 %v2467_v36  ;;  %v2252_v8 = vsel %vm448_vm0, %v2247_v42, %v2251_v19  ;;  %v4808_v14 = vpop.f32.mrf.mxu1  ;;  %v2253_v6 = vshrl.u32 %v3878_v22, 16 }
 0x1bf   : > { %2380 = vmatmul.bf16.gmra.mxu3 %v2244_v34  ;;  %v2257_v34 = vshll.u32 %v3879_v28, 16 }
 0x1c0   : > { %v2255_v59 = vor.u32 %v2253_v6, %v2251_v19 }
 0x1c1   : > { %v978_v16 = vpop.f32.mrf.mxu2  ;;  %v2259_v36 = vrot.slane %v2257_v34, 1 }
 0x1c2   : > { %v1232_v46 = vpop.f32.mrf.mxu3  ;;  %v1005_v44 = vadd.f32 %v978_v16, %v4616_v45  ;;  %v1795_v16 = vadd.f32 %v4733_v13, %v4649_v49 }
 0x1c3   : > { %v1592_v37 = vpop.f32.mrf.mxu0 }
 0x1c4   : > { %v1259_v53 = vadd.f32 %v1232_v46, %v1005_v44  ;;  %v2470_v44 = vrot.slane %v3879_v28, 1 }
 0x1c6   : > { %v4802_v48 = vadd.f32 %v1590_v25, %v1259_v53  ;;  %v4817_v46 = vpop.f32.mrf.mxu1  ;;  %v3859_v53 = vld [vmem:[%s4251_s10 + $0x60] sm:$0xff]  ;;  %v2471_v49 = vsel %vm828_vm1, %v2468_v58, %v2470_v44 }
 0x1c9   : > { %v980_v54 = vpop.f32.mrf.mxu2 }
 0x1ca   : > { %v1234_v3 = vpop.f32.mrf.mxu3  ;;  %v1006_v62 = vadd.f32 %v980_v54, %v4627_v0 }
 0x1cb   : > { %v2545_v57 = vpop.f32.mrf.mxu0 }
 0x1cc   : > { %v1260_v45 = vadd.f32 %v1234_v3, %v1006_v62  ;;  %v4829_v3 = vld [vmem:[%s4251_s10 + $0x70] sm:$0xff]  ;;  %v1796_v62 = vadd.f32 %v4744_v47, %v4659_v1  ;;  %v1797_v47 = vadd.f32 %v4753_v51, %v4668_v32 }
 0x1ce   : > { %2027 = vmatmul.bf16.gmra.mxu2 %v3858_v9  ;;  %v4810_v20 = vadd.f32 %v1592_v37, %v1260_v45  ;;  %2584 = vmatmul.bf16.gmra.mxu0 %v2469_v2  ;;  %v2260_v37 = vsel %vm448_vm0, %v2255_v59, %v2259_v36  ;;  %v2096_v59 = vld [vmem:[%s4251_s10 + $0x78] sm:$0x1] }
 0x1cf   : > { %2385 = vmatmul.bf16.gmra.mxu3 %v2252_v8 }
 0x1d1   : > { %v1988_v7 = vpop.f32.mrf.mxu2 }
 0x1d2   : > { %v2346_v0 = vpop.f32.mrf.mxu3  ;;  %v2048_v24 = vadd.f32 %v1988_v7, %v1794_v15  ;;  %v2261_v7 = vshrl.u32 %v3879_v28, 16 }
 0x1d3   : > { %v2547_v5 = vpop.f32.mrf.mxu0 }
 0x1d4   : > { %v2406_v25 = vadd.f32 %v2346_v0, %v2048_v24  ;;  %v2265_v0 = vshll.u32 %v4829_v3, 16 }
 0x1d6   : > { %v2605_v29 = vadd.f32 %v2545_v57, %v2406_v25  ;;  %v4834_v57 = vpop.f32.mrf.mxu1  ;;  %v2267_v1 = vrot.slane %v2265_v0, 1  ;;  %v2472_v25 = vrot.slane %v4829_v3, 1 }
 0x1d8   : > { %v2633_v13 = vadd.f32 %v4822_v63, %v2605_v29 }
 0x1d9   : > { %v1990_v50 = vpop.f32.mrf.mxu2 }
 0x1da   : > { %v2348_v26 = vpop.f32.mrf.mxu3  ;;  %v2049_v22 = vadd.f32 %v1990_v50, %v1795_v16  ;;  %v2657_v2 = vmax.f32 %v2633_v13, 0.0 }
 0x1db   : > { %v2550_v19 = vpop.f32.mrf.mxu0 }
 0x1dc   : > { %v2407_v42 = vadd.f32 %v2348_v26, %v2049_v22  ;;  %v3860_v22 = vld [vmem:[%s4251_s10 + $0x68] sm:$0xff] }
 0x1de   : > { %v2606_v54 = vadd.f32 %v2547_v5, %v2407_v42  ;;  %2032 = vmatmul.bf16.gmra.mxu2 %v3859_v53  ;;  %2589 = vmatmul.bf16.gmra.mxu0 %v2471_v49  ;;  %v2263_v5 = vor.u32 %v2261_v7, %v2259_v36  ;;  %v2163_v53 = vunpack.c.l.b16 %v2096_v59  ;;  %v2473_v36 = vsel %vm828_vm1, %v2470_v44, %v2472_v25 }
 0x1df   : > { %2390 = vmatmul.bf16.gmra.mxu3 %v2260_v37  ;;  %v4843_v37 = vpop.f32.mrf.mxu1  ;;  %v2269_v44 = vshrl.u32 %v4829_v3, 16 }
 0x1e0   : > { %v2634_v9 = vadd.f32 %v4822_v63, %v2606_v54  ;;  %v2268_v28 = vsel %vm448_vm0, %v2263_v5, %v2267_v1  ;;  %v2176_v51 = vpack.c.b16 %v2163_v53, %v2163_v53 }
 0x1e1   : > { %v1993_v8 = vpop.f32.mrf.mxu2 }
 0x1e2   : > { %v2351_v45 = vpop.f32.mrf.mxu3  ;;  %v2658_v58 = vmax.f32 %v2634_v9, 0.0  ;;  %v2050_v15 = vadd.f32 %v1993_v8, %v1796_v62 }
 0x1e3   : > { %v2552_v6 = vpop.f32.mrf.mxu0 }
 0x1e4   : > { %v2681_v24 = vpack.c.bf16 %v2658_v58, %v2657_v2  ;;  %v2408_v34 = vadd.f32 %v2351_v45, %v2050_v15  ;;  %v2273_v58 = vshll.u32 %v2176_v51, 16 }
 0x1e6   : > { %2769 = vmatmul.bf16.vlgmr.msra.gmra.mxu1 %v2681_v24  ;;  %v2607_v26 = vadd.f32 %v2550_v19, %v2408_v34  ;;  %v1798_v19 = vadd.f32 %v4764_v23, %v4674_v41  ;;  %v2275_v34 = vrot.slane %v2273_v58, 1  ;;  %v1799_v41 = vadd.f32 %v4771_v39, %v4683_v61 }
 0x1e7   : > { %v4851_v0 = vpop.f32.mrf.mxu1  ;;  %v2474_v23 = vrot.slane %v2176_v51, 1  ;;  %v1800_v61 = vadd.f32 %v4785_v60, %v4689_v27 }
 0x1e8   : > { %v2635_v13 = vadd.f32 %v4822_v63, %v2607_v26 }
 0x1e9   : > { %v1995_v16 = vpop.f32.mrf.mxu2 }
 0x1ea   : > { %v2353_v50 = vpop.f32.mrf.mxu3  ;;  %v2051_v29 = vadd.f32 %v1995_v16, %v1797_v47  ;;  %v2659_v8 = vmax.f32 %v2635_v13, 0.0 }
 0x1eb   : > { %v2555_v49 = vpop.f32.mrf.mxu0 }
 0x1ec   : > { %v2409_v42 = vadd.f32 %v2353_v50, %v2051_v29  ;;  %v3861_v50 = vld [vmem:[%s4251_s10 + $0x70] sm:$0xff]  ;;  %s307_s10 = smul.u32 24, %s4135_s21 }
 0x1ed   : > { %s4067_s21 = smul.u32 48, %s5039_s22 }
 0x1ee   : > { %v2608_v32 = vadd.f32 %v2552_v6, %v2409_v42  ;;  %2037 = vmatmul.bf16.gmra.mxu2 %v3860_v22  ;;  %2594 = vmatmul.bf16.gmra.mxu0 %v2473_v36  ;;  %v2271_v6 = vor.u32 %v2269_v44, %v2267_v1  ;;  %v2475_v22 = vsel %vm828_vm1, %v2472_v25, %v2474_v23  ;;  %p310_p7 = scmp.lt.s32.totalorder %s307_s10, 47 }
 0x1ef   : > { %2395 = vmatmul.bf16.gmra.mxu3 %v2268_v28  ;;  %v4861_v39 = vpop.f32.mrf.mxu1 }
 0x1f0   : > { %v2636_v54 = vadd.f32 %v4822_v63, %v2608_v32  ;;  %v2276_v3 = vsel %vm448_vm0, %v2271_v6, %v2275_v34  ;;  %s5043_s10 = smov (!%p310_p7, %s307_s10), 47 }
 0x1f1   : > { %v1998_v62 = vpop.f32.mrf.mxu2  ;;  %s4916_s12 = sadd.s32 %s4067_s21, %s5043_s10 }
 0x1f2   : > { %v2356_v9 = vpop.f32.mrf.mxu3  ;;  %v2660_v45 = vmax.f32 %v2636_v54, 0.0  ;;  %v2052_v2 = vadd.f32 %v1998_v62, %v1798_v19  ;;  %v1801_v54 = vadd.f32 %v4790_v30, %v4695_v10  ;;  %s3088_s13 = sshll.u32 %s4916_s12, 2 }
 0x1f3   : > { %v2557_v15 = vpop.f32.mrf.mxu0  ;;  %s4928_s15 = scalar_lea.vmem %s5026_s5, %s3088_s13  ;;  %s4949_s20 = scalar_lea.vmem %s5027_s6, %s3088_s13 }
 0x1f4   : > { %v2682_v7 = vpack.c.bf16 %v2660_v45, %v2659_v8  ;;  %v2410_v24 = vadd.f32 %v2356_v9, %v2052_v2 }
 0x1f6   : > { %2774 = vmatmul.bf16.gmra.mxu1 %v2682_v7  ;;  %v2609_v59 = vadd.f32 %v2555_v49, %v2410_v24 }
 0x1f7   : > { %v4866_v8 = vpop.f32.mrf.mxu1 }
 0x1f8   : > { %v2637_v28 = vadd.f32 %v4822_v63, %v2609_v59  ;;  %v1803_v59 = vadd.f32 %v4808_v14, %v4708_v35 }
 0x1f9   : > { %v2000_v5 = vpop.f32.mrf.mxu2 }
 0x1fa   : > { %v2358_v47 = vpop.f32.mrf.mxu3  ;;  %v2053_v16 = vadd.f32 %v2000_v5, %v1799_v41  ;;  %v2661_v36 = vmax.f32 %v2637_v28, 0.0 }
 0x1fb   : > { %v2560_v29 = vpop.f32.mrf.mxu0 }
 0x1fc   : > { %v2411_v26 = vadd.f32 %v2358_v47, %v2053_v16 }
 0x1fe   : > { %v2610_v53 = vadd.f32 %v2557_v15, %v2411_v26  ;;  %2042 = vmatmul.bf16.gmra.mxu2 %v3861_v50  ;;  %2599 = vmatmul.bf16.gmra.mxu0 %v2475_v22  ;;  %v1802_v15 = vadd.f32 %v4800_v52, %v4702_v40 }
 0x1ff   : > { %2400 = vmatmul.bf16.gmra.mxu3 %v2276_v3  ;;  %v4872_v41 = vpop.f32.mrf.mxu1 }
 0x200   : > { %v2638_v1 = vadd.f32 %v4822_v63, %v2610_v53  ;;  %v1804_v53 = vadd.f32 %v4817_v46, %v4715_v17 }
 0x201   : > { %v2003_v42 = vpop.f32.mrf.mxu2 }
 0x202   : > { %v2361_v49 = vpop.f32.mrf.mxu3  ;;  %v2662_v13 = vmax.f32 %v2638_v1, 0.0  ;;  %v2054_v32 = vadd.f32 %v2003_v42, %v1800_v61 }
 0x203   : > { %v2562_v51 = vpop.f32.mrf.mxu0 }
 0x204   : > { %v2683_v25 = vpack.c.bf16 %v2662_v13, %v2661_v36  ;;  %v2412_v19 = vadd.f32 %v2361_v49, %v2054_v32 }
 0x206   : > { %2779 = vmatmul.bf16.gmra.mxu1 %v2683_v25  ;;  %v2611_v27 = vadd.f32 %v2560_v29, %v2412_v19 }
 0x207   : > { %v4876_v29 = vpop.f32.mrf.mxu1 }
 0x208   : > { %v2639_v44 = vadd.f32 %v4822_v63, %v2611_v27 }
 0x209   : > { %v2005_v62 = vpop.f32.mrf.mxu2 }
 0x20a   : > { %v2363_v9 = vpop.f32.mrf.mxu3  ;;  %v2055_v60 = vadd.f32 %v2005_v62, %v1801_v54  ;;  %v2663_v34 = vmax.f32 %v2639_v44, 0.0 }
 0x20b   : > { %v2565_v2 = vpop.f32.mrf.mxu0 }
 0x20c   : > { %v2413_v45 = vadd.f32 %v2363_v9, %v2055_v60 }
 0x20e   : > { %v2612_v58 = vadd.f32 %v2562_v51, %v2413_v45  ;;  %v1805_v51 = vadd.f32 %v4834_v57, %v4721_v43  ;;  %v1806_v45 = vadd.f32 %v4843_v37, %v4727_v55 }
 0x20f   : > { %v4884_v25 = vpop.f32.mrf.mxu1 }
 0x210   : > { %v2640_v7 = vadd.f32 %v4822_v63, %v2612_v58 }
 0x211   : > { %v2008_v24 = vpop.f32.mrf.mxu2 }
 0x212   : > { %v2366_v6 = vpop.f32.mrf.mxu3  ;;  %v2664_v10 = vmax.f32 %v2640_v7, 0.0  ;;  %v2056_v30 = vadd.f32 %v2008_v24, %v1802_v15 }
 0x213   : > { %v2567_v23 = vpop.f32.mrf.mxu0 }
 0x214   : > { %v2684_v5 = vpack.c.bf16 %v2664_v10, %v2663_v34  ;;  %v2414_v47 = vadd.f32 %v2366_v6, %v2056_v30  ;;  %v1807_v10 = vadd.f32 %v4851_v0, %v4735_v21 }
 0x216   : > { %2784 = vmatmul.bf16.gmra.mxu1 %v2684_v5  ;;  %v2613_v3 = vadd.f32 %v2565_v2, %v2414_v47 }
 0x217   : > { %v4890_v15 = vpop.f32.mrf.mxu1 }
 0x218   : > { %v2641_v22 = vadd.f32 %v4822_v63, %v2613_v3  ;;  %v1808_v3 = vadd.f32 %v4861_v39, %v4742_v31 }
 0x219   : > { %v2010_v16 = vpop.f32.mrf.mxu2 }
 0x21a   : > { %v2368_v50 = vpop.f32.mrf.mxu3  ;;  %v2057_v40 = vadd.f32 %v2010_v16, %v1803_v59  ;;  %v2665_v49 = vmax.f32 %v2641_v22, 0.0 }
 0x21b   : > { %v2570_v26 = vpop.f32.mrf.mxu0 }
 0x21c   : > { %v2415_v52 = vadd.f32 %v2368_v50, %v2057_v40 }
 0x21e   : > { %v2614_v28 = vadd.f32 %v2567_v23, %v2415_v52 }
 0x21f   : > { %v4894_v37 = vpop.f32.mrf.mxu1 }
 0x220   : > { %v2642_v61 = vadd.f32 %v4822_v63, %v2614_v28 }
 0x221   : > { %v2013_v1 = vpop.f32.mrf.mxu2 }
 0x222   : > { %v2371_v42 = vpop.f32.mrf.mxu3  ;;  %v2666_v35 = vmax.f32 %v2642_v61, 0.0  ;;  %v2058_v14 = vadd.f32 %v2013_v1, %v1804_v53 }
 0x223   : > { %v2572_v36 = vpop.f32.mrf.mxu0 }
 0x224   : > { %v2685_v13 = vpack.c.bf16 %v2666_v35, %v2665_v49  ;;  %v2416_v32 = vadd.f32 %v2371_v42, %v2058_v14  ;;  %v1809_v42 = vadd.f32 %v4866_v8, %v4750_v12 }
 0x226   : > { %2789 = vmatmul.bf16.gmra.mxu1 %v2685_v13  ;;  %v2615_v62 = vadd.f32 %v2570_v26, %v2416_v32 }
 0x227   : > { %v4900_v61 = vpop.f32.mrf.mxu1 }
 0x228   : > { %v2643_v27 = vadd.f32 %v4822_v63, %v2615_v62 }
 0x229   : > { %v2015_v19 = vpop.f32.mrf.mxu2 }
 0x22a   : > { %v2373_v54 = vpop.f32.mrf.mxu3  ;;  %v2059_v17 = vadd.f32 %v2015_v19, %v1805_v51  ;;  %v2667_v43 = vmax.f32 %v2643_v27, 0.0  ;;  %v1810_v51 = vadd.f32 %v4872_v41, %v4759_v11 }
 0x22b   : > { %v2575_v9 = vpop.f32.mrf.mxu0 }
 0x22c   : > { %v2417_v46 = vadd.f32 %v2373_v54, %v2059_v17 }
 0x22e   : > { %v2616_v60 = vadd.f32 %v2572_v36, %v2417_v46 }
 0x22f   : > { %v4908_v19 = vpop.f32.mrf.mxu1 }
 0x230   : > { %v2644_v2 = vadd.f32 %v4822_v63, %v2616_v60 }
 0x231   : > { %v2018_v44 = vpop.f32.mrf.mxu2 }
 0x232   : > { %v2376_v58 = vpop.f32.mrf.mxu3  ;;  %v2668_v57 = vmax.f32 %v2644_v2, 0.0  ;;  %v2060_v7 = vadd.f32 %v2018_v44, %v1806_v45  ;;  %v1811_v45 = vadd.f32 %v4876_v29, %v4767_v18  ;;  %v1812_v18 = vadd.f32 %v4884_v25, %v4773_v38 }
 0x233   : > { %v2577_v24 = vpop.f32.mrf.mxu0 }
 0x234   : > { %v2686_v6 = vpack.c.bf16 %v2668_v57, %v2667_v43  ;;  %v2418_v34 = vadd.f32 %v2376_v58, %v2060_v7 }
 0x236   : > { %2794 = vmatmul.bf16.gmra.mxu1 %v2686_v6  ;;  %v2617_v5 = vadd.f32 %v2575_v9, %v2418_v34 }
 0x237   : > { %v4914_v58 = vpop.f32.mrf.mxu1 }
 0x238   : > { %v2645_v16 = vadd.f32 %v4822_v63, %v2617_v5 }
 0x239   : > { %v2020_v30 = vpop.f32.mrf.mxu2 }
 0x23a   : > { %v2378_v23 = vpop.f32.mrf.mxu3  ;;  %v2061_v55 = vadd.f32 %v2020_v30, %v1807_v10  ;;  %v2669_v22 = vmax.f32 %v2645_v16, 0.0  ;;  %v1813_v16 = vadd.f32 %v4890_v15, %v4779_v56  ;;  %v1814_v15 = vadd.f32 %v4894_v37, %v4788_v4  ;;  %v4028_v37 = vld [vmem:[%s4928_s15 + $0x8] sm:$0xff]  }
 0x23b   : > { %v2580_v59 = vpop.f32.mrf.mxu0 }
 0x23c   : > { %v2419_v47 = vadd.f32 %v2378_v23, %v2061_v55  ;;  %v4933_v55 = vld [vmem:[%s5025_s4] ss:$0 sm:$0xff] }
 0x23e   : > { %v2618_v50 = vadd.f32 %v2577_v24, %v2419_v47  ;;  %v3914_v47 = vld [vmem:[%s4928_s15] sm:$0xff]  }
 0x240   : > { %v2646_v40 = vadd.f32 %v4822_v63, %v2618_v50 }
 0x241   : > { %v2023_v52 = vpop.f32.mrf.mxu2 }
 0x242   : > { %v2381_v26 = vpop.f32.mrf.mxu3  ;;  %v2670_v21 = vmax.f32 %v2646_v40, 0.0  ;;  %v2062_v0 = vadd.f32 %v2023_v52, %v1808_v3  ;;  %v3915_v3 = vunpack.c.l.bf16 %v3914_v47 }
 0x243   : > { %v2582_v28 = vpop.f32.mrf.mxu0 }
 0x244   : > { %v2687_v53 = vpack.c.bf16 %v2670_v21, %v2669_v22  ;;  %v2420_v1 = vadd.f32 %v2381_v26, %v2062_v0  ;;  %v3916_v21 = vunpack.c.h.bf16 %v3914_v47 }
 0x246   : > { %2799 = vmatmul.bf16.gmra.mxu1 %v2687_v53  ;;  %v2619_v31 = vadd.f32 %v2580_v59, %v2420_v1 }
 0x248   : > { %v2647_v13 = vadd.f32 %v4822_v63, %v2619_v31 }
 0x249   : > { %v2025_v49 = vpop.f32.mrf.mxu2 }
 0x24a   : > { %v2383_v35 = vpop.f32.mrf.mxu3  ;;  %v2063_v39 = vadd.f32 %v2025_v49, %v1809_v42  ;;  %v2671_v8 = vmax.f32 %v2647_v13, 0.0 }
 0x24b   : > { %v2585_v36 = vpop.f32.mrf.mxu0 }
 0x24c   : > { %v2421_v14 = vadd.f32 %v2383_v35, %v2063_v39 }
 0x24e   : > { %v2620_v32 = vadd.f32 %v2582_v28, %v2421_v14 }
 0x250   : > { %v2648_v54 = vadd.f32 %v4822_v63, %v2620_v32 }
 0x251   : > { %v2028_v62 = vpop.f32.mrf.mxu2 }
 0x252   : > { %v2386_v12 = vpop.f32.mrf.mxu3  ;;  %v2672_v17 = vmax.f32 %v2648_v54, 0.0  ;;  %v2064_v46 = vadd.f32 %v2028_v62, %v1810_v51 }
 0x253   : > { %v2587_v9 = vpop.f32.mrf.mxu0 }
 0x254   : > { %v2688_v27 = vpack.c.bf16 %v2672_v17, %v2671_v8  ;;  %v2422_v60 = vadd.f32 %v2386_v12, %v2064_v46  ;;  %v1815_v17 = vadd.f32 %v4900_v61, %v4796_v33  ;;  %v1816_v61 = vadd.f32 %v4908_v19, %v4802_v48 }
 0x255   : > { %v1817_v48 = vadd.f32 %v4914_v58, %v4810_v20 }
 0x256   : > { %2804 = vmatmul.bf16.gmra.mxu1 %v2688_v27  ;;  %v2621_v2 = vadd.f32 %v2585_v36, %v2422_v60 }
 0x258   : > { %v2649_v7 = vadd.f32 %v4822_v63, %v2621_v2  ;;  %v3920_v2 = vunpack.c.h.bf16 %v4028_v37 }
 0x259   : > { %v2030_v11 = vpop.f32.mrf.mxu2 }
 0x25a   : > { %v2388_v41 = vpop.f32.mrf.mxu3  ;;  %v2065_v44 = vadd.f32 %v2030_v11, %v1811_v45  ;;  %v2673_v10 = vmax.f32 %v2649_v7, 0.0 }
 0x25b   : > { %v2590_v57 = vpop.f32.mrf.mxu0 }
 0x25c   : > { %v2423_v43 = vadd.f32 %v2388_v41, %v2065_v44 }
 0x25e   : > { %v2622_v24 = vadd.f32 %v2587_v9, %v2423_v43  ;;  %v3919_v9 = vunpack.c.l.bf16 %v4028_v37 }
 0x260   : > { %v2650_v29 = vadd.f32 %v4822_v63, %v2622_v24 }
 0x261   : > { %v2033_v6 = vpop.f32.mrf.mxu2 }
 0x262   : > { %v2391_v34 = vpop.f32.mrf.mxu3  ;;  %v2674_v30 = vmax.f32 %v2650_v29, 0.0  ;;  %v2066_v23 = vadd.f32 %v2033_v6, %v1812_v18 }
 0x263   : > { %v2770_v5 = vpop.f32.mrf.mxu1  ;;  %v2592_v38 = vpop.f32.mrf.mxu0 }
 0x264   : > { %v2689_v25 = vpack.c.bf16 %v2674_v30, %v2673_v10  ;;  %v2424_v59 = vadd.f32 %v2391_v34, %v2066_v23  ;;  %v2771_v50 = vadd.f32 %v4933_v55, %v2770_v5 }
 0x266   : > { %2809 = vmatmul.bf16.gmra.mxu1 %v2689_v25  ;;  %v2623_v26 = vadd.f32 %v2590_v57, %v2424_v59  ;;  %v2878_v28 = vadd.f32 %v3915_v3, %v2771_v50  ;;  %v4029_v50 = vld [vmem:[%s4928_s15 + $0x10] sm:$0xff]  }
 0x268   : > { %v2651_v42 = vadd.f32 %v4822_v63, %v2623_v26  ;;  %v2902_v31 = vmax.f32 %v2878_v28, 0.0 }
 0x269   : > { %v2035_v40 = vpop.f32.mrf.mxu2 }
 0x26a   : > { %v2393_v52 = vpop.f32.mrf.mxu3  ;;  %v2067_v22 = vadd.f32 %v2035_v40, %v1813_v16  ;;  %v2675_v32 = vmax.f32 %v2651_v42, 0.0  ;;  %v3923_v40 = vunpack.c.l.bf16 %v4029_v50 }
 0x26b   : > { %v2772_v0 = vpop.f32.mrf.mxu1  ;;  %v2595_v56 = vpop.f32.mrf.mxu0 }
 0x26c   : > { %v2425_v53 = vadd.f32 %v2393_v52, %v2067_v22  ;;  %v2773_v1 = vadd.f32 %v4933_v55, %v2772_v0 }
 0x26e   : > { %v2624_v49 = vadd.f32 %v2592_v38, %v2425_v53  ;;  %v2879_v35 = vadd.f32 %v3916_v21, %v2773_v1  ;;  %v3924_v21 = vunpack.c.h.bf16 %v4029_v50 }
 0x270   : > { %v2652_v39 = vadd.f32 %v4822_v63, %v2624_v49  ;;  %v2903_v14 = vmax.f32 %v2879_v35, 0.0 }
 0x271   : > { %v2038_v36 = vpop.f32.mrf.mxu2 }
 0x272   : > { %v2396_v13 = vpop.f32.mrf.mxu3  ;;  %v2676_v51 = vmax.f32 %v2652_v39, 0.0  ;;  %v3964_v54 = vpack.c.bf16 %v2903_v14, %v2902_v31  ;;  %v2068_v62 = vadd.f32 %v2038_v36, %v1814_v15 }
 0x273   : > { %v2775_v12 = vpop.f32.mrf.mxu1  ;;  %v2597_v27 = vpop.f32.mrf.mxu0 }
 0x274   : > { %3965 = vst [vmem:[%s4949_s20] sm:$0xff] %v3964_v54   ;;  %v2690_v4 = vpack.c.bf16 %v2676_v51, %v2675_v32  ;;  %v2426_v8 = vadd.f32 %v2396_v13, %v2068_v62  ;;  %v2776_v46 = vadd.f32 %v4933_v55, %v2775_v12  ;;  %v4030_v51 = vld [vmem:[%s4928_s15 + $0x18] sm:$0xff]  }
 0x275   : > { %v3927_v62 = vunpack.c.l.bf16 %v4030_v51  ;;  %v3928_v12 = vunpack.c.h.bf16 %v4030_v51 }
 0x276   : > { %2814 = vmatmul.bf16.gmra.mxu1 %v2690_v4  ;;  %v2625_v11 = vadd.f32 %v2595_v56, %v2426_v8  ;;  %v2880_v43 = vadd.f32 %v3919_v9, %v2776_v46 }
 0x278   : > { %v2653_v24 = vadd.f32 %v4822_v63, %v2625_v11  ;;  %v2904_v29 = vmax.f32 %v2880_v43, 0.0 }
 0x279   : > { %v2040_v60 = vpop.f32.mrf.mxu2 }
 0x27a   : > { %v2398_v45 = vpop.f32.mrf.mxu3  ;;  %v2069_v41 = vadd.f32 %v2040_v60, %v1815_v17  ;;  %v2677_v23 = vmax.f32 %v2653_v24, 0.0  ;;  %v4031_v60 = vld [vmem:[%s4928_s15 + $0x20] sm:$0xff]  }
 0x27b   : > { %v2777_v44 = vpop.f32.mrf.mxu1  ;;  %v2600_v47 = vpop.f32.mrf.mxu0  ;;  %v3931_v11 = vunpack.c.l.bf16 %v4031_v60 }
 0x27c   : > { %v2427_v57 = vadd.f32 %v2398_v45, %v2069_v41  ;;  %v2778_v7 = vadd.f32 %v4933_v55, %v2777_v44  ;;  %v3932_v41 = vunpack.c.h.bf16 %v4031_v60 }
 0x27e   : > { %v2626_v18 = vadd.f32 %v2597_v27, %v2427_v57  ;;  %v2881_v33 = vadd.f32 %v3920_v2, %v2778_v7 }
 0x280   : > { %v2654_v6 = vadd.f32 %v4822_v63, %v2626_v18  ;;  %v2905_v34 = vmax.f32 %v2881_v33, 0.0 }
 0x281   : > { %v2043_v10 = vpop.f32.mrf.mxu2 }
 0x282   : > { %v2401_v30 = vpop.f32.mrf.mxu3  ;;  %v2678_v5 = vmax.f32 %v2654_v6, 0.0  ;;  %v3969_v38 = vpack.c.bf16 %v2905_v34, %v2904_v29  ;;  %v2070_v25 = vadd.f32 %v2043_v10, %v1816_v61  ;;  %v4032_v61 = vld [vmem:[%s4928_s15 + $0x28] sm:$0xff]  }
 0x283   : > { %v2780_v59 = vpop.f32.mrf.mxu1  ;;  %v2602_v49 = vpop.f32.mrf.mxu0  ;;  %v3935_v6 = vunpack.c.l.bf16 %v4032_v61  ;;  %v3936_v34 = vunpack.c.h.bf16 %v4032_v61 }
 0x284   : > { %4039 = vst [vmem:[%s4949_s20 + $0x8] sm:$0xff] %v3969_v38   ;;  %v2691_v16 = vpack.c.bf16 %v2678_v5, %v2677_v23  ;;  %v2428_v3 = vadd.f32 %v2401_v30, %v2070_v25  ;;  %v2781_v19 = vadd.f32 %v4933_v55, %v2780_v59 }
 0x286   : > { %2819 = vmatmul.bf16.gmra.mxu1 %v2691_v16  ;;  %v2627_v26 = vadd.f32 %v2600_v47, %v2428_v3  ;;  %v2882_v53 = vadd.f32 %v3923_v40, %v2781_v19  ;;  %v4033_v16 = vld [vmem:[%s4928_s15 + $0x30] sm:$0xff]  }
 0x287   : > { %v3939_v3 = vunpack.c.l.bf16 %v4033_v16 }
 0x288   : > { %v2655_v35 = vadd.f32 %v4822_v63, %v2627_v26  ;;  %v2906_v58 = vmax.f32 %v2882_v53, 0.0  ;;  %v4034_v53 = vld [vmem:[%s4928_s15 + $0x38] sm:$0xff]  }
 0x289   : > { %v2045_v52 = vpop.f32.mrf.mxu2 }
 0x28a   : > { %v2071_v22 = vadd.f32 %v2045_v52, %v1817_v48  ;;  %v2403_v0 = vpop.f32.mrf.mxu3  ;;  %v2679_v39 = vmax.f32 %v2655_v35, 0.0  ;;  %v3940_v48 = vunpack.c.h.bf16 %v4033_v16 }
 0x28b   : > { %v2782_v28 = vpop.f32.mrf.mxu1 }
 0x28c   : > { %v2429_v1 = vadd.f32 %v2403_v0, %v2071_v22  ;;  %v2783_v42 = vadd.f32 %v4933_v55, %v2782_v28 }
 0x28e   : > { %v2628_v56 = vadd.f32 %v2602_v49, %v2429_v1  ;;  %v2883_v20 = vadd.f32 %v3924_v21, %v2783_v42  ;;  %v3943_v42 = vunpack.c.l.bf16 %v4034_v53  ;;  %v3944_v49 = vunpack.c.h.bf16 %v4034_v53 }
 0x290   : > { %v2656_v15 = vadd.f32 %v4822_v63, %v2628_v56  ;;  %v2907_v31 = vmax.f32 %v2883_v20, 0.0 }
 0x292   : > { %v2680_v14 = vmax.f32 %v2656_v15, 0.0  ;;  %v3974_v36 = vpack.c.bf16 %v2907_v31, %v2906_v58 }
 0x293   : > { %v2785_v13 = vpop.f32.mrf.mxu1 }
 0x294   : > { %4040 = vst [vmem:[%s4949_s20 + $0x10] sm:$0xff] %v3974_v36   ;;  %v2692_v32 = vpack.c.bf16 %v2680_v14, %v2679_v39  ;;  %v2786_v54 = vadd.f32 %v4933_v55, %v2785_v13  ;;  %v4035_v36 = vld [vmem:[%s4928_s15 + $0x40] sm:$0xff]  }
 0x295   : > { %v3948_v51 = vunpack.c.h.bf16 %v4035_v36 }
 0x296   : > { %2824 = vmatmul.bf16.gmra.mxu1 %v2692_v32  ;;  %v2884_v37 = vadd.f32 %v3927_v62, %v2786_v54  ;;  %v3947_v32 = vunpack.c.l.bf16 %v4035_v36 }
 0x298   : > { %v2908_v17 = vmax.f32 %v2884_v37, 0.0 }
 0x29b   : > { %v2787_v4 = vpop.f32.mrf.mxu1 }
 0x29c   : > { %v2788_v8 = vadd.f32 %v4933_v55, %v2787_v4 }
 0x29e   : > { %v2885_v63 = vadd.f32 %v3928_v12, %v2788_v8 }
 0x2a0   : > { %v2909_v46 = vmax.f32 %v2885_v63, 0.0 }
 0x2a2   : > { %v3979_v9 = vpack.c.bf16 %v2909_v46, %v2908_v17  ;;  %v4036_v46 = vld [vmem:[%s4928_s15 + $0x48] sm:$0xff]  }
 0x2a3   : > { %v2790_v27 = vpop.f32.mrf.mxu1  ;;  %v3952_v60 = vunpack.c.h.bf16 %v4036_v46 }
 0x2a4   : > { %4041 = vst [vmem:[%s4949_s20 + $0x18] sm:$0xff] %v3979_v9   ;;  %v2791_v45 = vadd.f32 %v4933_v55, %v2790_v27  ;;  %v3951_v27 = vunpack.c.l.bf16 %v4036_v46 }
 0x2a6   : > { %v2886_v44 = vadd.f32 %v3931_v11, %v2791_v45 }
 0x2a8   : > { %v2910_v7 = vmax.f32 %v2886_v44, 0.0 }
 0x2ab   : > { %v2792_v2 = vpop.f32.mrf.mxu1 }
 0x2ac   : > { %v2793_v43 = vadd.f32 %v4933_v55, %v2792_v2 }
 0x2ae   : > { %v2887_v57 = vadd.f32 %v3932_v41, %v2793_v43 }
 0x2b0   : > { %v2911_v24 = vmax.f32 %v2887_v57, 0.0 }
 0x2b2   : > { %v3984_v18 = vpack.c.bf16 %v2911_v24, %v2910_v7  ;;  %v4037_v24 = vld [vmem:[%s4928_s15 + $0x50] sm:$0xff]  }
 0x2b3   : > { %v2795_v33 = vpop.f32.mrf.mxu1  ;;  %v3956_v61 = vunpack.c.h.bf16 %v4037_v24 }
 0x2b4   : > { %4042 = vst [vmem:[%s4949_s20 + $0x20] sm:$0xff] %v3984_v18   ;;  %v2796_v29 = vadd.f32 %v4933_v55, %v2795_v33  ;;  %v3955_v33 = vunpack.c.l.bf16 %v4037_v24 }
 0x2b6   : > { %v2888_v30 = vadd.f32 %v3935_v6, %v2796_v29 }
 0x2b8   : > { %v2912_v38 = vmax.f32 %v2888_v30, 0.0 }
 0x2bb   : > { %v2797_v10 = vpop.f32.mrf.mxu1 }
 0x2bc   : > { %v2798_v23 = vadd.f32 %v4933_v55, %v2797_v10 }
 0x2be   : > { %v2889_v5 = vadd.f32 %v3936_v34, %v2798_v23 }
 0x2c0   : > { %v2913_v25 = vmax.f32 %v2889_v5, 0.0 }
 0x2c2   : > { %v3989_v47 = vpack.c.bf16 %v2913_v25, %v2912_v38  ;;  %v4038_v25 = vld [vmem:[%s4928_s15 + $0x58] sm:$0xff]  }
 0x2c3   : > { %v2800_v59 = vpop.f32.mrf.mxu1  ;;  %v3960_v16 = vunpack.c.h.bf16 %v4038_v25 }
 0x2c4   : > { %4043 = vst [vmem:[%s4949_s20 + $0x28] sm:$0xff] %v3989_v47   ;;  %v2801_v50 = vadd.f32 %v4933_v55, %v2800_v59  ;;  %v3959_v59 = vunpack.c.l.bf16 %v4038_v25 }
 0x2c6   : > { %v2890_v40 = vadd.f32 %v3939_v3, %v2801_v50 }
 0x2c8   : > { %v2914_v22 = vmax.f32 %v2890_v40, 0.0 }
 0x2cb   : > { %v2802_v19 = vpop.f32.mrf.mxu1 }
 0x2cc   : > { %v2803_v52 = vadd.f32 %v4933_v55, %v2802_v19 }
 0x2ce   : > { %v2891_v26 = vadd.f32 %v3940_v48, %v2803_v52 }
 0x2d0   : > { %v2915_v21 = vmax.f32 %v2891_v26, 0.0 }
 0x2d2   : > { %v3994_v0 = vpack.c.bf16 %v2915_v21, %v2914_v22 }
 0x2d3   : > { %v2805_v28 = vpop.f32.mrf.mxu1 }
 0x2d4   : > { %4044 = vst [vmem:[%s4949_s20 + $0x30] sm:$0xff] %v3994_v0   ;;  %v2806_v1 = vadd.f32 %v4933_v55, %v2805_v28 }
 0x2d6   : > { %v2892_v56 = vadd.f32 %v3943_v42, %v2806_v1 }
 0x2d8   : > { %v2916_v15 = vmax.f32 %v2892_v56, 0.0 }
 0x2db   : > { %v2807_v35 = vpop.f32.mrf.mxu1 }
 0x2dc   : > { %v2808_v20 = vadd.f32 %v4933_v55, %v2807_v35 }
 0x2de   : > { %v2893_v58 = vadd.f32 %v3944_v49, %v2808_v20 }
 0x2e0   : > { %v2917_v31 = vmax.f32 %v2893_v58, 0.0 }
 0x2e2   : > { %v3999_v39 = vpack.c.bf16 %v2917_v31, %v2916_v15 }
 0x2e3   : > { %v2810_v14 = vpop.f32.mrf.mxu1 }
 0x2e4   : > { %4045 = vst [vmem:[%s4949_s20 + $0x38] sm:$0xff] %v3999_v39   ;;  %v2811_v13 = vadd.f32 %v4933_v55, %v2810_v14 }
 0x2e6   : > { %v2894_v62 = vadd.f32 %v3947_v32, %v2811_v13 }
 0x2e8   : > { %v2918_v37 = vmax.f32 %v2894_v62, 0.0 }
 0x2eb   : > { %v2812_v54 = vpop.f32.mrf.mxu1 }
 0x2ec   : > { %v2813_v12 = vadd.f32 %v4933_v55, %v2812_v54 }
 0x2ee   : > { %v2895_v4 = vadd.f32 %v3948_v51, %v2813_v12 }
 0x2f0   : > { %v2919_v8 = vmax.f32 %v2895_v4, 0.0 }
 0x2f2   : > { %v4004_v63 = vpack.c.bf16 %v2919_v8, %v2918_v37 }
 0x2f3   : > { %v2815_v17 = vpop.f32.mrf.mxu1 }
 0x2f4   : > { %4046 = vst [vmem:[%s4949_s20 + $0x40] sm:$0xff] %v4004_v63   ;;  %v2816_v9 = vadd.f32 %v4933_v55, %v2815_v17 }
 0x2f6   : > { %v2896_v11 = vadd.f32 %v3951_v27, %v2816_v9 }
 0x2f8   : > { %v2920_v44 = vmax.f32 %v2896_v11, 0.0 }
 0x2fb   : > { %v2817_v45 = vpop.f32.mrf.mxu1 }
 0x2fc   : > { %v2818_v41 = vadd.f32 %v4933_v55, %v2817_v45 }
 0x2fe   : > { %v2897_v2 = vadd.f32 %v3952_v60, %v2818_v41 }
 0x300   : > { %v2921_v43 = vmax.f32 %v2897_v2, 0.0 }
 0x302   : > { %v4009_v57 = vpack.c.bf16 %v2921_v43, %v2920_v44 }
 0x303   : > { %v2820_v7 = vpop.f32.mrf.mxu1 }
 0x304   : > { %4047 = vst [vmem:[%s4949_s20 + $0x48] sm:$0xff] %v4009_v57   ;;  %v2821_v18 = vadd.f32 %v4933_v55, %v2820_v7 }
 0x306   : > { %v2898_v6 = vadd.f32 %v3955_v33, %v2821_v18 }
 0x308   : > { %v2922_v30 = vmax.f32 %v2898_v6, 0.0 }
 0x30b   : > { %v2822_v29 = vpop.f32.mrf.mxu1 }
 0x30c   : > { %v2823_v34 = vadd.f32 %v4933_v55, %v2822_v29 }
 0x30e   : > { %v2899_v10 = vadd.f32 %v3956_v61, %v2823_v34 }
 0x310   : > { %v2923_v23 = vmax.f32 %v2899_v10, 0.0 }
 0x312   : > { %v4014_v5 = vpack.c.bf16 %v2923_v23, %v2922_v30 }
 0x313   : > { %v2825_v38 = vpop.f32.mrf.mxu1 }
 0x314   : > { %4048 = vst [vmem:[%s4949_s20 + $0x50] sm:$0xff] %v4014_v5   ;;  %v2826_v47 = vadd.f32 %v4933_v55, %v2825_v38 }
 0x316   : > { %v2900_v3 = vadd.f32 %v3959_v59, %v2826_v47 }
 0x318   : > { %v2924_v40 = vmax.f32 %v2900_v3, 0.0 }
 0x31b   : > { %v2827_v50 = vpop.f32.mrf.mxu1 }
 0x31c   : > { %v2828_v48 = vadd.f32 %v4933_v55, %v2827_v50 }
 0x31e   : > { %v2901_v19 = vadd.f32 %v3960_v16, %v2828_v48 }
 0x320   : > { %v2925_v52 = vmax.f32 %v2901_v19, 0.0 }
 0x322   : > { %v4019_v26 = vpack.c.bf16 %v2925_v52, %v2924_v40 }
 0x324   : > { %4049 = vst [vmem:[%s4949_s20 + $0x58] sm:$0xff] %v4019_v26  }
 0x325 PF: > { %s16_s25 = sadd.s32 1, %s4151_s25   ;;  %s5028_s21 = smov %s4143_s23 }
 0x326   : > { %p13_p8 = scmp.ge.s32.totalorder %s16_s25, 6   ;;  %s5029_s22 = smov %s4147_s24 }
 0x327   : > { %s5030_s23 = smov %s5033_s26  ;;  %s5031_s24 = smov %s5037_s27 }
 0x328   :  { %15 = sbr.rel (!%p13_p8) target bundleno = 3 (0x3), region = 85 }

</bundles_post_ra>
